<compile_context>
chip_gen: v6e
topology: v6e:2x2x1
jax: 0.10.0
libtpu: 0.0.40
codegen_flags: <defaults>
</compile_context>

<pallas_src>
import functools

import jax
import jax.numpy as jnp
from jax.experimental import pallas as pl
from jax.experimental.pallas import tpu as pltpu

EPS = 1e-5            # torch BatchNorm2d default eps
FORGET_BIAS = 1.0
_VMEM_LIMIT = 48 * 1024 * 1024


# --------------------------------------------------------------------------
# Kernels
# --------------------------------------------------------------------------
def _stats_kernel(pw_ref, wbd_ref, sum_ref, sumsq_ref, *, ksize, width, rows,
                  nlanes):
    """Pass 1: per-channel sum / sum-of-squares of [conv_x | conv_h] outputs.

    pw_ref  : [ (TH+2p)*W, k*(Cin+nh) ] bf16   halo'd row slab of W-patches
    wbd_ref : [ k, k*(Cin+nh), 8*nh ]  bf16   block-diagonal [[wx,0],[0,wh]]
    outputs : [8, 8*nh] f32 accumulator block per core (row 0 holds the sums)
    """
    @pl.when(pl.program_id(1) == 0)
    def _():
        sum_ref[...] = jnp.zeros_like(sum_ref)
        sumsq_ref[...] = jnp.zeros_like(sumsq_ref)

    acc = jnp.zeros((rows, nlanes), jnp.float32)
    for dh in range(ksize):                       # k row-shifted taps (static)
        acc += jnp.dot(pw_ref[dh * width: dh * width + rows, :], wbd_ref[dh],
                       preferred_element_type=jnp.float32)

    sum_ref[0:1, :] += jnp.sum(acc, axis=0, keepdims=True)
    sumsq_ref[0:1, :] += jnp.sum(acc * acc, axis=0, keepdims=True)


def _gates_kernel(pw_ref, wg_ref, shift_ref, c_ref, hc_ref, *, ksize, width,
                  rows, nh):
    """Pass 2: conv (BN scales folded into weights) + shift + LSTM gates.

    pw_ref  : [ (TH+2p)*W, k*(Cin+nh) ] bf16
    wg_ref  : [ k, k*(Cin+nh), 4*nh ]   bf16   scale-folded fused weights
    shift   : [1, 4*nh] f32  (BN shifts + forget bias on the f lanes)
    c_ref   : [rows, nh] f32
    hc_ref  : [rows, 2*nh] f32   (h_next || c_next)
    """
    acc = jnp.zeros((rows, 4 * nh), jnp.float32)
    for dh in range(ksize):
        acc += jnp.dot(pw_ref[dh * width: dh * width + rows, :], wg_ref[dh],
                       preferred_element_type=jnp.float32)
    y = acc + shift_ref[...]

    i = jax.nn.sigmoid(y[:, 0 * nh:1 * nh])
    f = jax.nn.sigmoid(y[:, 1 * nh:2 * nh])
    g = jnp.tanh(y[:, 2 * nh:3 * nh])
    o = jax.nn.sigmoid(y[:, 3 * nh:4 * nh])

    c_next = f * c_ref[...] + i * g
    hc_ref[...] = jnp.concatenate([o * jnp.tanh(c_next), c_next], axis=-1)


# --------------------------------------------------------------------------
# Wrapper glue (layout, W-patches, halo'd slabs, BN finalization)
# --------------------------------------------------------------------------
def _w_im2col(img, ksize, pad):
    """[B,H,W,C] -> [B,H,W,k*C]; lane index = dw*C + c (dw-major, c-minor)."""
    B, H, W, C = img.shape
    p = jnp.pad(img, ((0, 0), (0, 0), (pad, pad), (0, 0)))
    return jnp.concatenate([p[:, :, dw:dw + W, :] for dw in range(ksize)],
                           axis=-1)


def _tap_weights(w_oihw):
    """[4*nh, C, k, k] (OIHW) -> [k, k*C, 4*nh]; rows dw-major, c-minor."""
    o, c, kh, kw = w_oihw.shape
    return jnp.transpose(w_oihw, (2, 3, 1, 0)).reshape(kh, kw * c, o)


def _h_slabs(a, th, n_t, pad):
    """[B,H,W,D] -> [B*n_t, (th+2*pad)*W, D] halo'd row slabs (flattened)."""
    B, H, W, D = a.shape
    a = jnp.pad(a, ((0, 0), (pad, n_t * th - H + pad), (0, 0), (0, 0)))
    slabs = jnp.stack([a[:, t * th: t * th + th + 2 * pad]
                       for t in range(n_t)], axis=1)     # [B, n_t, THp, W, D]
    return slabs.reshape(B * n_t, (th + 2 * pad) * W, D)


def conv_lstm_cell(x, h, c, params, *, num_hidden, filter_size, stride=1,
                   tile_h=None):
    """x: [B, Cin, H, W]; h, c: [B, num_hidden, H, W] (NCHW).

    Returns (h_next, c_next) in NCHW, matching the torch module's forward in
    default training mode (BatchNorm uses batch statistics).
    """
    assert stride == 1, "stride must be 1 so h/c spatial dims are preserved"
    assert filter_size % 2 == 1, "odd filter_size required for SAME padding"
    k = filter_size
    pad = k // 2
    B, Cin, H, W = x.shape
    nh = num_hidden
    C4 = 4 * nh
    R = B * H * W                       # true number of output rows

    if tile_h is None:                  # target ~4096 rows per grid step
        tile_h = max(1, min(H, 4096 // max(W, 1)))
    TH = min(tile_h, H)
    n_t = -(-H // TH)
    THp = TH + 2 * pad
    RT = TH * W                         # output rows per slab
    THpW = THp * W                      # slab rows incl. halo
    kCx = k * Cin
    kCh = k * nh
    Kc = kCx + kCh

    # NHWC, cast to bf16 BEFORE any patch materialization.
    x_nhwc = jnp.transpose(x, (0, 2, 3, 1)).astype(jnp.bfloat16)
    h_nhwc = jnp.transpose(h, (0, 2, 3, 1)).astype(jnp.bfloat16)
    c_nhwc = jnp.transpose(c, (0, 2, 3, 1)).astype(jnp.float32)

    # W-direction patches only (k-fold, not k*k-fold); x and h concatenated so
    # both passes stream a single slab array.
    pw_img = jnp.concatenate([_w_im2col(x_nhwc, k, pad),
                              _w_im2col(h_nhwc, k, pad)], axis=-1)  # [B,H,W,Kc]
    pw = _h_slabs(pw_img, TH, n_t, pad)                 # [B*n_t, THpW, Kc]

    c_pad = jnp.pad(c_nhwc, ((0, 0), (0, n_t * TH - H), (0, 0), (0, 0)))
    c_rows = c_pad.reshape(B, n_t, TH, W, nh).reshape(B * n_t, RT, nh)

    NS0 = B * n_t
    NS = NS0 + (NS0 % 2)      # even so the stats pass splits across 2 cores
    if NS != NS0:             # zero slab contributes 0 to the BN sums
        pw = jnp.pad(pw, ((0, NS - NS0), (0, 0), (0, 0)))
        c_rows = jnp.pad(c_rows, ((0, NS - NS0), (0, 0), (0, 0)))

    wx_tap = _tap_weights(params["wx"])                 # [k, kCx, C4] f32
    wh_tap = _tap_weights(params["wh"])                 # [k, kCh, C4] f32

    # ---------------- pass 1: BN batch statistics ----------------
    w_bd = jnp.concatenate(
        [jnp.concatenate([wx_tap, jnp.zeros((k, kCx, C4), wx_tap.dtype)], -1),
         jnp.concatenate([jnp.zeros((k, kCh, C4), wh_tap.dtype), wh_tap], -1)],
        axis=1).astype(jnp.bfloat16)                    # [k, Kc, 2*C4]

    nsh = NS // 2
    stat_shape = jax.ShapeDtypeStruct((16, 2 * C4), jnp.float32)
    sums, sumsqs = pl.pallas_call(
        functools.partial(_stats_kernel, ksize=k, width=W, rows=RT,
                          nlanes=2 * C4),
        out_shape=(stat_shape, stat_shape),
        grid=(2, nsh),
        in_specs=[
            pl.BlockSpec((None, THpW, Kc), lambda cc, i: (cc * nsh + i, 0, 0)),
            pl.BlockSpec((k, Kc, 2 * C4), lambda cc, i: (0, 0, 0)),
        ],
        out_specs=(pl.BlockSpec((8, 2 * C4), lambda cc, i: (cc, 0)),
                   pl.BlockSpec((8, 2 * C4), lambda cc, i: (cc, 0))),
        compiler_params=pltpu.CompilerParams(
            dimension_semantics=("parallel", "arbitrary"),
            vmem_limit_bytes=_VMEM_LIMIT),
    )(pw, w_bd)

    ssum = sums[0] + sums[8]            # combine the two per-core partials
    ssq = sumsqs[0] + sumsqs[8]
    rN = jnp.float32(R)
    mean = ssum / rN
    var = jnp.maximum(ssq / rN - mean * mean, 0.0)   # biased var, like torch BN
    gamma = jnp.concatenate([params["gamma_x"], params["gamma_h"]])
    beta = jnp.concatenate([params["beta_x"], params["beta_h"]])
    scale = gamma * jax.lax.rsqrt(var + EPS)
    shift_cat = beta - mean * scale
    scale_x, scale_h = scale[:C4], scale[C4:]
    shift = shift_cat[:C4] + shift_cat[C4:]
    shift = shift.at[nh:2 * nh].add(FORGET_BIAS)     # fold forget bias
    shift = shift.reshape(1, C4).astype(jnp.float32)

    # ---------------- pass 2: conv + BN (folded) + LSTM gates ----------------
    w_g = jnp.concatenate([wx_tap * scale_x[None, None, :],
                           wh_tap * scale_h[None, None, :]],
                          axis=1).astype(jnp.bfloat16)   # [k, Kc, C4]

    hc = pl.pallas_call(
        functools.partial(_gates_kernel, ksize=k, width=W, rows=RT, nh=nh),
        out_shape=jax.ShapeDtypeStruct((NS, RT, 2 * nh), jnp.float32),
        grid=(NS,),
        in_specs=[
            pl.BlockSpec((None, THpW, Kc), lambda i: (i, 0, 0)),
            pl.BlockSpec((k, Kc, C4), lambda i: (0, 0, 0)),
            pl.BlockSpec((1, C4), lambda i: (0, 0)),
            pl.BlockSpec((None, RT, nh), lambda i: (i, 0, 0)),
        ],
        out_specs=pl.BlockSpec((None, RT, 2 * nh), lambda i: (i, 0, 0)),
        compiler_params=pltpu.CompilerParams(
            dimension_semantics=("parallel",),           # megacore-shardable
            vmem_limit_bytes=_VMEM_LIMIT),
    )(pw, w_g, shift, c_rows)

    hc = hc[:NS0].reshape(B, n_t * TH, W, 2 * nh)[:, :H]
    h_next = jnp.transpose(hc[..., :nh], (0, 3, 1, 2))
    c_next = jnp.transpose(hc[..., nh:], (0, 3, 1, 2))
    return h_next, c_next


# --------------------------------------------------------------------------
# Pure-JAX reference (matches the torch module's training-mode forward)
# --------------------------------------------------------------------------
def ref_conv_lstm_cell(x, h, c, params, *, num_hidden, filter_size):
    pad = filter_size // 2

    def conv(inp, w):
        return jax.lax.conv_general_dilated(
            inp, w, window_strides=(1, 1),
            padding=((pad, pad), (pad, pad)),
            dimension_numbers=("NCHW", "OIHW", "NCHW"),
            precision=jax.lax.Precision.HIGHEST)

    def bn(y, gamma, beta):
        mean = jnp.mean(y, axis=(0, 2, 3), keepdims=True)
        var = jnp.mean((y - mean) ** 2, axis=(0, 2, 3), keepdims=True)
        yhat = (y - mean) / jnp.sqrt(var + EPS)
        return yhat * gamma.reshape(1, -1, 1, 1) + beta.reshape(1, -1, 1, 1)

    xc = bn(conv(x, params["wx"]), params["gamma_x"], params["beta_x"])
    hc = bn(conv(h, params["wh"]), params["gamma_h"], params["beta_h"])
    i_x, f_x, g_x, o_x = jnp.split(xc, 4, axis=1)
    i_h, f_h, g_h, o_h = jnp.split(hc, 4, axis=1)
    i = jax.nn.sigmoid(i_x + i_h)
    f = jax.nn.sigmoid(f_x + f_h + FORGET_BIAS)
    g = jnp.tanh(g_x + g_h)
    o = jax.nn.sigmoid(o_x + o_h)
    c_next = f * c + i * g
    h_next = o * jnp.tanh(c_next)
    return h_next, c_next


if __name__ == "__main__":
    B, Cin, H, W = 2, 4, 16, 16
    nh, ksize, stride = 32, 3, 1

    key = jax.random.PRNGKey(0)
    ks = jax.random.split(key, 9)
    x = jax.random.normal(ks[0], (B, Cin, H, W), jnp.float32)
    h0 = jax.random.normal(ks[1], (B, nh, H, W), jnp.float32)
    c0 = jax.random.normal(ks[2], (B, nh, H, W), jnp.float32)

    params = {
        "wx": 0.1 * jax.random.normal(ks[3], (4 * nh, Cin, ksize, ksize), jnp.float32),
        "wh": 0.1 * jax.random.normal(ks[4], (4 * nh, nh, ksize, ksize), jnp.float32),
        "gamma_x": 1.0 + 0.1 * jax.random.normal(ks[5], (4 * nh,), jnp.float32),
        "beta_x": 0.1 * jax.random.normal(ks[6], (4 * nh,), jnp.float32),
        "gamma_h": 1.0 + 0.1 * jax.random.normal(ks[7], (4 * nh,), jnp.float32),
        "beta_h": 0.1 * jax.random.normal(ks[8], (4 * nh,), jnp.float32),
    }

    # tile_h=8 at this toy size so the grid has 2 halo'd row slabs per image,
    # exercising the slab/halo logic, the tiled BN-stat accumulation, and the
    # two-core stats split (NS = 4).  Real sizes auto-pick ~4096-row slabs.
    step = jax.jit(functools.partial(conv_lstm_cell, num_hidden=nh,
                                     filter_size=ksize, stride=stride,
                                     tile_h=8))
    h1, c1 = step(x, h0, c0, params)
    jax.block_until_ready((h1, c1))

    h_ref, c_ref = ref_conv_lstm_cell(x, h0, c0, params,
                                      num_hidden=nh, filter_size=ksize)
    err = max(float(jnp.max(jnp.abs(h1 - h_ref))),
              float(jnp.max(jnp.abs(c1 - c_ref))))
    assert err < 5e-2, f"mismatch vs reference: max abs err = {err}"
    print("KERNEL_OK")
</pallas_src>

<mosaic_0001>
module attributes {stable_mosaic.version = 11 : i64} {
  func.func @_stats_kernel(%arg0: i32, %arg1: i32, %arg2: memref<1x160x108xbf16, #tpu.memory_space<vmem>>, %arg3: memref<3x108x256xbf16, #tpu.memory_space<vmem>>, %arg4: memref<8x256xf32, #tpu.memory_space<vmem>>, %arg5: memref<8x256xf32, #tpu.memory_space<vmem>>) attributes {dimension_semantics = [#tpu.dimension_semantics<parallel>, #tpu.dimension_semantics<arbitrary>], iteration_bounds = array<i64: 2, 2>, scalar_prefetch = 0 : i64, scratch_operands = 0 : i64, tpu.core_type = #tpu.core_type<tc>, window_params = [{transform_indices = @transform_0, window_bounds = array<i64: 1, 160, 108>}, {pipeline_mode = #tpu.pipeline_mode<synchronous>, transform_indices = @transform_1, window_bounds = array<i64: 3, 108, 256>}, {transform_indices = @transform_2, window_bounds = array<i64: 8, 256>}, {transform_indices = @transform_3, window_bounds = array<i64: 8, 256>}]} {
    %c0_i32 = arith.constant 0 : i32
    %0 = arith.cmpi eq, %arg1, %c0_i32 : i32
    %1 = arith.extui %0 : i1 to i32
    %c0_i32_0 = arith.constant 0 : i32
    %2 = arith.cmpi ne, %1, %c0_i32_0 : i32
    scf.if %2 {
      %cst_27 = arith.constant 0.000000e+00 : f32
      %33 = vector.broadcast %cst_27 : f32 to vector<8x256xf32>
      %c0_28 = arith.constant 0 : index
      %c0_29 = arith.constant 0 : index
      %34 = vector.load %arg4[%c0_28, %c0_29] : memref<8x256xf32, #tpu.memory_space<vmem>>, vector<8x256xf32>
      tpu.vector_store %arg4[%c0_28, %c0_29], %33 {strides = array<i32>} : memref<8x256xf32, #tpu.memory_space<vmem>>, vector<8x256xf32>,
      %cst_30 = arith.constant 0.000000e+00 : f32
      %35 = vector.broadcast %cst_30 : f32 to vector<8x256xf32>
      %c0_31 = arith.constant 0 : index
      %c0_32 = arith.constant 0 : index
      %36 = vector.load %arg5[%c0_31, %c0_32] : memref<8x256xf32, #tpu.memory_space<vmem>>, vector<8x256xf32>
      tpu.vector_store %arg5[%c0_31, %c0_32], %35 {strides = array<i32>} : memref<8x256xf32, #tpu.memory_space<vmem>>, vector<8x256xf32>,
    } else {
    }
    %cst = arith.constant 0.000000e+00 : f32
    %3 = vector.broadcast %cst : f32 to vector<128x256xf32>
    %c0 = arith.constant 0 : index
    %c0_1 = arith.constant 0 : index
    %c0_2 = arith.constant 0 : index
    %4 = vector.load %arg2[%c0, %c0_1, %c0_2] : memref<1x160x108xbf16, #tpu.memory_space<vmem>>, vector<1x128x108xbf16>
    %5 = vector.shape_cast %4 : vector<1x128x108xbf16> to vector<128x108xbf16>
    %c0_3 = arith.constant 0 : index
    %c0_4 = arith.constant 0 : index
    %c0_5 = arith.constant 0 : index
    %6 = vector.load %arg3[%c0_3, %c0_4, %c0_5] : memref<3x108x256xbf16, #tpu.memory_space<vmem>>, vector<1x108x256xbf16>
    %7 = vector.shape_cast %6 : vector<1x108x256xbf16> to vector<108x256xbf16>
    %cst_6 = arith.constant dense<0.000000e+00> : vector<128x256xf32>
    %8 = tpu.matmul %5, %7, %cst_6 {dimension_numbers = #tpu.dot_dimension_numbers<[1], [0], [0], [1], [0, 0, 1, 1], [], []>} : vector<128x108xbf16>, vector<108x256xbf16>, vector<128x256xf32> -> vector<128x256xf32>
    %9 = arith.addf %3, %8 : vector<128x256xf32>
    %c0_7 = arith.constant 0 : index
    %c16 = arith.constant 16 : index
    %c0_8 = arith.constant 0 : index
    %10 = vector.load %arg2[%c0_7, %c16, %c0_8] : memref<1x160x108xbf16, #tpu.memory_space<vmem>>, vector<1x128x108xbf16>
    %11 = vector.shape_cast %10 : vector<1x128x108xbf16> to vector<128x108xbf16>
    %c1 = arith.constant 1 : index
    %c0_9 = arith.constant 0 : index
    %c0_10 = arith.constant 0 : index
    %12 = vector.load %arg3[%c1, %c0_9, %c0_10] : memref<3x108x256xbf16, #tpu.memory_space<vmem>>, vector<1x108x256xbf16>
    %13 = vector.shape_cast %12 : vector<1x108x256xbf16> to vector<108x256xbf16>
    %cst_11 = arith.constant dense<0.000000e+00> : vector<128x256xf32>
    %14 = tpu.matmul %11, %13, %cst_11 {dimension_numbers = #tpu.dot_dimension_numbers<[1], [0], [0], [1], [0, 0, 1, 1], [], []>} : vector<128x108xbf16>, vector<108x256xbf16>, vector<128x256xf32> -> vector<128x256xf32>
    %15 = arith.addf %9, %14 : vector<128x256xf32>
    %c0_12 = arith.constant 0 : index
    %c32 = arith.constant 32 : index
    %c0_13 = arith.constant 0 : index
    %16 = vector.load %arg2[%c0_12, %c32, %c0_13] : memref<1x160x108xbf16, #tpu.memory_space<vmem>>, vector<1x128x108xbf16>
    %17 = vector.shape_cast %16 : vector<1x128x108xbf16> to vector<128x108xbf16>
    %c2 = arith.constant 2 : index
    %c0_14 = arith.constant 0 : index
    %c0_15 = arith.constant 0 : index
    %18 = vector.load %arg3[%c2, %c0_14, %c0_15] : memref<3x108x256xbf16, #tpu.memory_space<vmem>>, vector<1x108x256xbf16>
    %19 = vector.shape_cast %18 : vector<1x108x256xbf16> to vector<108x256xbf16>
    %cst_16 = arith.constant dense<0.000000e+00> : vector<128x256xf32>
    %20 = tpu.matmul %17, %19, %cst_16 {dimension_numbers = #tpu.dot_dimension_numbers<[1], [0], [0], [1], [0, 0, 1, 1], [], []>} : vector<128x108xbf16>, vector<108x256xbf16>, vector<128x256xf32> -> vector<128x256xf32>
    %21 = arith.addf %15, %20 : vector<128x256xf32>
    %c0_17 = arith.constant 0 : index
    %c0_18 = arith.constant 0 : index
    %22 = vector.load %arg4[%c0_17, %c0_18] : memref<8x256xf32, #tpu.memory_space<vmem>>, vector<1x256xf32>
    %cst_19 = arith.constant dense<0.000000e+00> : vector<256xf32>
    %23 = vector.multi_reduction <add>, %21, %cst_19 [0] : vector<128x256xf32> to vector<256xf32>
    %24 = vector.shape_cast %23 : vector<256xf32> to vector<1x256xf32>
    %25 = arith.addf %22, %24 : vector<1x256xf32>
    %c0_20 = arith.constant 0 : index
    %c0_21 = arith.constant 0 : index
    %26 = vector.load %arg4[%c0_20, %c0_21] : memref<8x256xf32, #tpu.memory_space<vmem>>, vector<1x256xf32>
    tpu.vector_store %arg4[%c0_20, %c0_21], %25 {strides = array<i32>} : memref<8x256xf32, #tpu.memory_space<vmem>>, vector<1x256xf32>,
    %c0_22 = arith.constant 0 : index
    %c0_23 = arith.constant 0 : index
    %27 = vector.load %arg5[%c0_22, %c0_23] : memref<8x256xf32, #tpu.memory_space<vmem>>, vector<1x256xf32>
    %28 = arith.mulf %21, %21 : vector<128x256xf32>
    %cst_24 = arith.constant dense<0.000000e+00> : vector<256xf32>
    %29 = vector.multi_reduction <add>, %28, %cst_24 [0] : vector<128x256xf32> to vector<256xf32>
    %30 = vector.shape_cast %29 : vector<256xf32> to vector<1x256xf32>
    %31 = arith.addf %27, %30 : vector<1x256xf32>
    %c0_25 = arith.constant 0 : index
    %c0_26 = arith.constant 0 : index
    %32 = vector.load %arg5[%c0_25, %c0_26] : memref<8x256xf32, #tpu.memory_space<vmem>>, vector<1x256xf32>
    tpu.vector_store %arg5[%c0_25, %c0_26], %31 {strides = array<i32>} : memref<8x256xf32, #tpu.memory_space<vmem>>, vector<1x256xf32>,
    return
  }
  func.func @transform_0(%arg0: i32, %arg1: i32) -> (i32, i32, i32) {
    %c2_i32 = arith.constant 2 : i32
    %0 = arith.muli %arg0, %c2_i32 : i32
    %1 = arith.addi %0, %arg1 : i32
    %c0_i32 = arith.constant 0 : i32
    %c0_i32_0 = arith.constant 0 : i32
    %c0_i32_1 = arith.constant 0 : i32
    return %1, %c0_i32, %c0_i32_0 : i32, i32, i32
  }
  func.func @transform_1(%arg0: i32, %arg1: i32) -> (i32, i32, i32) {
    %c0_i32 = arith.constant 0 : i32
    %c0_i32_0 = arith.constant 0 : i32
    %c0_i32_1 = arith.constant 0 : i32
    %c0_i32_2 = arith.constant 0 : i32
    return %c0_i32, %c0_i32_0, %c0_i32_1 : i32, i32, i32
  }
  func.func @transform_2(%arg0: i32, %arg1: i32) -> (i32, i32) {
    %c0_i32 = arith.constant 0 : i32
    %c0_i32_0 = arith.constant 0 : i32
    return %arg0, %c0_i32 : i32, i32
  }
  func.func @transform_3(%arg0: i32, %arg1: i32) -> (i32, i32) {
    %c0_i32 = arith.constant 0 : i32
    %c0_i32_0 = arith.constant 0 : i32
    return %arg0, %c0_i32 : i32, i32
  }
}

module attributes {stable_mosaic.version = 11 : i64} {
  func.func @_gates_kernel(%arg0: i32, %arg1: memref<1x160x108xbf16, #tpu.memory_space<vmem>>, %arg2: memref<3x108x128xbf16, #tpu.memory_space<vmem>>, %arg3: memref<1x128xf32, #tpu.memory_space<vmem>>, %arg4: memref<1x128x32xf32, #tpu.memory_space<vmem>>, %arg5: memref<1x128x64xf32, #tpu.memory_space<vmem>>) attributes {dimension_semantics = [#tpu.dimension_semantics<parallel>], iteration_bounds = array<i64: 4>, scalar_prefetch = 0 : i64, scratch_operands = 0 : i64, tpu.core_type = #tpu.core_type<tc>, window_params = [{transform_indices = @transform_0, window_bounds = array<i64: 1, 160, 108>}, {pipeline_mode = #tpu.pipeline_mode<synchronous>, transform_indices = @transform_1, window_bounds = array<i64: 3, 108, 128>}, {pipeline_mode = #tpu.pipeline_mode<synchronous>, transform_indices = @transform_2, window_bounds = array<i64: 1, 128>}, {transform_indices = @transform_3, window_bounds = array<i64: 1, 128, 32>}, {transform_indices = @transform_4, window_bounds = array<i64: 1, 128, 64>}]} {
    %cst = arith.constant 0.000000e+00 : f32
    %0 = vector.broadcast %cst : f32 to vector<128x128xf32>
    %c0 = arith.constant 0 : index
    %c0_0 = arith.constant 0 : index
    %c0_1 = arith.constant 0 : index
    %1 = vector.load %arg1[%c0, %c0_0, %c0_1] : memref<1x160x108xbf16, #tpu.memory_space<vmem>>, vector<1x128x108xbf16>
    %2 = vector.shape_cast %1 : vector<1x128x108xbf16> to vector<128x108xbf16>
    %c0_2 = arith.constant 0 : index
    %c0_3 = arith.constant 0 : index
    %c0_4 = arith.constant 0 : index
    %3 = vector.load %arg2[%c0_2, %c0_3, %c0_4] : memref<3x108x128xbf16, #tpu.memory_space<vmem>>, vector<1x108x128xbf16>
    %4 = vector.shape_cast %3 : vector<1x108x128xbf16> to vector<108x128xbf16>
    %cst_5 = arith.constant dense<0.000000e+00> : vector<128x128xf32>
    %5 = tpu.matmul %2, %4, %cst_5 {dimension_numbers = #tpu.dot_dimension_numbers<[1], [0], [0], [1], [0, 0, 1, 1], [], []>} : vector<128x108xbf16>, vector<108x128xbf16>, vector<128x128xf32> -> vector<128x128xf32>
    %6 = arith.addf %0, %5 : vector<128x128xf32>
    %c0_6 = arith.constant 0 : index
    %c16 = arith.constant 16 : index
    %c0_7 = arith.constant 0 : index
    %7 = vector.load %arg1[%c0_6, %c16, %c0_7] : memref<1x160x108xbf16, #tpu.memory_space<vmem>>, vector<1x128x108xbf16>
    %8 = vector.shape_cast %7 : vector<1x128x108xbf16> to vector<128x108xbf16>
    %c1 = arith.constant 1 : index
    %c0_8 = arith.constant 0 : index
    %c0_9 = arith.constant 0 : index
    %9 = vector.load %arg2[%c1, %c0_8, %c0_9] : memref<3x108x128xbf16, #tpu.memory_space<vmem>>, vector<1x108x128xbf16>
    %10 = vector.shape_cast %9 : vector<1x108x128xbf16> to vector<108x128xbf16>
    %cst_10 = arith.constant dense<0.000000e+00> : vector<128x128xf32>
    %11 = tpu.matmul %8, %10, %cst_10 {dimension_numbers = #tpu.dot_dimension_numbers<[1], [0], [0], [1], [0, 0, 1, 1], [], []>} : vector<128x108xbf16>, vector<108x128xbf16>, vector<128x128xf32> -> vector<128x128xf32>
    %12 = arith.addf %6, %11 : vector<128x128xf32>
    %c0_11 = arith.constant 0 : index
    %c32 = arith.constant 32 : index
    %c0_12 = arith.constant 0 : index
    %13 = vector.load %arg1[%c0_11, %c32, %c0_12] : memref<1x160x108xbf16, #tpu.memory_space<vmem>>, vector<1x128x108xbf16>
    %14 = vector.shape_cast %13 : vector<1x128x108xbf16> to vector<128x108xbf16>
    %c2 = arith.constant 2 : index
    %c0_13 = arith.constant 0 : index
    %c0_14 = arith.constant 0 : index
    %15 = vector.load %arg2[%c2, %c0_13, %c0_14] : memref<3x108x128xbf16, #tpu.memory_space<vmem>>, vector<1x108x128xbf16>
    %16 = vector.shape_cast %15 : vector<1x108x128xbf16> to vector<108x128xbf16>
    %cst_15 = arith.constant dense<0.000000e+00> : vector<128x128xf32>
    %17 = tpu.matmul %14, %16, %cst_15 {dimension_numbers = #tpu.dot_dimension_numbers<[1], [0], [0], [1], [0, 0, 1, 1], [], []>} : vector<128x108xbf16>, vector<108x128xbf16>, vector<128x128xf32> -> vector<128x128xf32>
    %18 = arith.addf %12, %17 : vector<128x128xf32>
    %c0_16 = arith.constant 0 : index
    %c0_17 = arith.constant 0 : index
    %19 = vector.load %arg3[%c0_16, %c0_17] : memref<1x128xf32, #tpu.memory_space<vmem>>, vector<1x128xf32>
    %20 = vector.broadcast %19 : vector<1x128xf32> to vector<128x128xf32>
    %21 = arith.addf %18, %20 : vector<128x128xf32>
    %22 = vector.extract_strided_slice %21 {offsets = [0, 0], sizes = [128, 32], strides = [1, 1]} : vector<128x128xf32> to vector<128x32xf32>
    %23 = arith.negf %22 : vector<128x32xf32>
    %24 = math.exp %23 : vector<128x32xf32>
    %cst_18 = arith.constant 1.000000e+00 : f32
    %25 = vector.broadcast %cst_18 : f32 to vector<128x32xf32>
    %26 = arith.addf %25, %24 : vector<128x32xf32>
    %27 = arith.divf %25, %26 : vector<128x32xf32>
    %28 = vector.extract_strided_slice %21 {offsets = [0, 32], sizes = [128, 32], strides = [1, 1]} : vector<128x128xf32> to vector<128x32xf32>
    %29 = arith.negf %28 : vector<128x32xf32>
    %30 = math.exp %29 : vector<128x32xf32>
    %cst_19 = arith.constant 1.000000e+00 : f32
    %31 = vector.broadcast %cst_19 : f32 to vector<128x32xf32>
    %32 = arith.addf %31, %30 : vector<128x32xf32>
    %33 = arith.divf %31, %32 : vector<128x32xf32>
    %34 = vector.extract_strided_slice %21 {offsets = [0, 64], sizes = [128, 32], strides = [1, 1]} : vector<128x128xf32> to vector<128x32xf32>
    %35 = math.tanh %34 : vector<128x32xf32>
    %36 = vector.extract_strided_slice %21 {offsets = [0, 96], sizes = [128, 32], strides = [1, 1]} : vector<128x128xf32> to vector<128x32xf32>
    %37 = arith.negf %36 : vector<128x32xf32>
    %38 = math.exp %37 : vector<128x32xf32>
    %cst_20 = arith.constant 1.000000e+00 : f32
    %39 = vector.broadcast %cst_20 : f32 to vector<128x32xf32>
    %40 = arith.addf %39, %38 : vector<128x32xf32>
    %41 = arith.divf %39, %40 : vector<128x32xf32>
    %c0_21 = arith.constant 0 : index
    %c0_22 = arith.constant 0 : index
    %c0_23 = arith.constant 0 : index
    %42 = vector.load %arg4[%c0_21, %c0_22, %c0_23] : memref<1x128x32xf32, #tpu.memory_space<vmem>>, vector<1x128x32xf32>
    %43 = vector.shape_cast %42 : vector<1x128x32xf32> to vector<128x32xf32>
    %44 = arith.mulf %33, %43 : vector<128x32xf32>
    %45 = arith.mulf %27, %35 : vector<128x32xf32>
    %46 = arith.addf %44, %45 : vector<128x32xf32>
    %47 = math.tanh %46 : vector<128x32xf32>
    %48 = arith.mulf %41, %47 : vector<128x32xf32>
    %49 = tpu.concatenate %48, %46 in 1 : vector<128x32xf32>, vector<128x32xf32> -> vector<128x64xf32>
    %c0_24 = arith.constant 0 : index
    %c0_25 = arith.constant 0 : index
    %c0_26 = arith.constant 0 : index
    %50 = vector.load %arg5[%c0_24, %c0_25, %c0_26] : memref<1x128x64xf32, #tpu.memory_space<vmem>>, vector<1x128x64xf32>
    %51 = vector.shape_cast %50 : vector<1x128x64xf32> to vector<128x64xf32>
    %52 = vector.shape_cast %49 : vector<128x64xf32> to vector<1x128x64xf32>
    tpu.vector_store %arg5[%c0_24, %c0_25, %c0_26], %52 {strides = array<i32>} : memref<1x128x64xf32, #tpu.memory_space<vmem>>, vector<1x128x64xf32>,
    return
  }
  func.func @transform_0(%arg0: i32) -> (i32, i32, i32) {
    %c0_i32 = arith.constant 0 : i32
    %c0_i32_0 = arith.constant 0 : i32
    %c0_i32_1 = arith.constant 0 : i32
    return %arg0, %c0_i32, %c0_i32_0 : i32, i32, i32
  }
  func.func @transform_1(%arg0: i32) -> (i32, i32, i32) {
    %c0_i32 = arith.constant 0 : i32
    %c0_i32_0 = arith.constant 0 : i32
    %c0_i32_1 = arith.constant 0 : i32
    %c0_i32_2 = arith.constant 0 : i32
    return %c0_i32, %c0_i32_0, %c0_i32_1 : i32, i32, i32
  }
  func.func @transform_2(%arg0: i32) -> (i32, i32) {
    %c0_i32 = arith.constant 0 : i32
    %c0_i32_0 = arith.constant 0 : i32
    %c0_i32_1 = arith.constant 0 : i32
    return %c0_i32, %c0_i32_0 : i32, i32
  }
  func.func @transform_3(%arg0: i32) -> (i32, i32, i32) {
    %c0_i32 = arith.constant 0 : i32
    %c0_i32_0 = arith.constant 0 : i32
    %c0_i32_1 = arith.constant 0 : i32
    return %arg0, %c0_i32, %c0_i32_0 : i32, i32, i32
  }
  func.func @transform_4(%arg0: i32) -> (i32, i32, i32) {
    %c0_i32 = arith.constant 0 : i32
    %c0_i32_0 = arith.constant 0 : i32
    %c0_i32_1 = arith.constant 0 : i32
    return %arg0, %c0_i32, %c0_i32_0 : i32, i32, i32
  }
}

</mosaic_0001>

<bundles_post_ra>
// kernel: conv_lstm_cell.2
= control target key start
LH: loop header
LB: loop body
LE: loop exit
PB: predicated region body
PF: predicated region fallthrough
CT: control target
= control target key end

     0   :  { %s1624_s12 = smov 0   ;;  %s1626_s13 = smov 0   ;;  %s1973_s0 = inlined_call_operand.vmem [shape: bf16[4,160,108], index: 0, kind: input, shape index: {}]   ;;  %s1974_s1 = inlined_call_operand.vmem [shape: bf16[3,108,256], index: 1, kind: input, shape index: {}]   ;;  %s1975_s2 = inlined_call_operand.vmem [shape: f32[16,256], index: 2, kind: output, shape index: {0}]   ;;  %s1976_s3 = inlined_call_operand.vmem [shape: f32[16,256], index: 3, kind: output, shape index: {1}]  }
   0x1   :  { %s1628_s14 = smov 0   ;;  %s1630_s15 = smov 0  }
   0x2   :  { %s1632_s16 = smov 0  }
   0x3 LB: > { %s23_s17 = sadd.s32 1, %s1591_s14  ;;  %s26_s18 = sadd.s32 1, %s1595_s15  ;;  %s1599_s16 = sphi %s1632_s16, %s14_s16   ;;  %s1595_s15 = sphi %s1630_s15, %s1982_s15   ;;  %s1591_s14 = sphi %s1628_s14, %s1981_s14   ;;  %s1587_s13 = sphi %s1626_s13, %s1980_s13   ;;  %s1583_s12 = sphi %s1624_s12, %s1979_s12  }
   0x4   : > { %p24_p0 = scmp.ge.s32.totalorder %s23_s17, 2  ;;  %p1297_p1 = scmp.ge.s32.totalorder %s1599_s16, 1 }
   0x5   : > { %p160_p2 = scmp.lt.s32.totalorder %s1599_s16, 5 }
   0x6   : > { %s1984_s17 = smov (%p24_p0, %s23_s17), 0  ;;  %s1986_s18 = smov (!%p24_p0, %s26_s18), %s1595_s15 }
   0x7   : > { %p161_p3 = pnand %p1297_p1, %p160_p2  ;;  %p28_p4 = scmp.ge.s32.totalorder %s1986_s18, 2 }
   0x9   : > { %s1988_s18 = smov (%p28_p4, %s1986_s18), 0  ;;  %164 = sbr.rel (%p161_p3) target bundleno = 371 (0x173), region = 28 }
   0xe   : > { %s1298_s19 = sshll.u32 %s1587_s13, 1  ;;  %p200_p5 = scmp.lt.s32.totalorder %s1587_s13, 1 }
   0xf   : > { %s192_s20 = sadd.s32 %s1583_s12, %s1298_s19  ;;  %p1304_p7 = scmp.ne.s32.totalorder %s1583_s12, 0 }
  0x10   : > { %p193_p6 = scmp.lt.s32.totalorder %s192_s20, 3  ;;  %s1990_s13 = smov (!%p200_p5, %s1587_s13), 1 }
  0x11   : > { %s1421_s21 = sshll.u32 %s1990_s13, 4  ;;  %214 = sbr.rel (%p1304_p7) target bundleno = 25 (0x19), region = 32 }
  0x12   : > { %s1992_s20 = smov (!%p193_p6, %s192_s20), 3  ;;  %s1657_s25 = scalar_lea.vmem %s1975_s2, %s1421_s21 }
  0x13   : > { %s1437_s22 = smul.u32 80, %s1992_s20  ;;  %s1662_s28 = scalar_lea.vmem %s1976_s3, %s1421_s21 }
  0x15   : > { %s1667_s4 = scalar_lea.vmem %s1973_s0, %s1437_s22 }
  0x16   : > { %v1601_v0 = vmov 0.0  }
  0x17   : > { %215 = vst [vmem:[%s1657_s25] sm:$0xff] %v1601_v0  ;;  %216 = vst [vmem:[%s1657_s25 + $0x8] sm:$0xff] %v1601_v0 }
  0x18   : > { %217 = vst [vmem:[%s1662_s28] sm:$0xff] %v1601_v0  ;;  %218 = vst [vmem:[%s1662_s28 + $0x8] sm:$0xff] %v1601_v0 }
  0x19 PF: > { %v1481_v1 = vld [vmem:[%s1974_s1 + $0xd4] ss:$8 sps:$4 sm:$0x3f]   ;;  %vm399_vm0 = vcmask 1045504   ;;  %v1484_v3 = vld [vmem:[%s1974_s1 + $0xc4] ss:$8 sps:$4 sm:$0xff]  }
  0x1a   : > { %v1483_v2 = vld [vmem:[%s1974_s1 + $0xd0] ss:$8 sps:$4 sm:$0x3f]   ;;  %1341 = vmatprep.subr.msk.bf16.mxu0 %vm399_vm0, %v1481_v1  ;;  %1423 = vmatprep.subr.msk.bf16.mxu1 %vm399_vm0, %v1481_v1  ;;  %v1602_v5 = vmov 0   ;;  %v1486_v6 = vld [vmem:[%s1974_s1 + $0xc0] ss:$8 sps:$4 sm:$0xff]  }
  0x1b   : > { %v401_v4 = vsel %vm399_vm0, %v1483_v2, 0  ;;  %438 = vmatprep.mubr.bf16.mxu0 %v1602_v5  ;;  %478 = vmatprep.mubr.bf16.mxu1 %v1602_v5  ;;  %v1487_v7 = vld [vmem:[%s1974_s1 + $0xb4] ss:$8 sps:$4 sm:$0xff]   ;;  %v1489_v8 = vld [vmem:[%s1974_s1 + $0xb0] ss:$8 sps:$4 sm:$0xff]   ;;  %v1733_v21 = vld [vmem:[%s1667_s4 + $0x8] sm:$0xff]  }
  0x1c   : > { %409 = vmatpush1.bf16.msra.mxu0 %v401_v4  ;;  %1430 = vmatpush1.bf16.msra.mxu1 %v401_v4  ;;  %v1490_v9 = vld [vmem:[%s1974_s1 + $0xa4] ss:$8 sps:$4 sm:$0xff]   ;;  %v1492_v10 = vld [vmem:[%s1974_s1 + $0xa0] ss:$8 sps:$4 sm:$0xff]   ;;  %v1493_v11 = vld [vmem:[%s1974_s1 + $0x94] ss:$8 sps:$4 sm:$0xff]  }
  0x1d   : > { %410 = vmatprep.subr.bf16.mxu0 %v1484_v3  ;;  %1424 = vmatprep.subr.bf16.mxu1 %v1484_v3  ;;  %v1495_v12 = vld [vmem:[%s1974_s1 + $0x90] ss:$8 sps:$4 sm:$0xff]   ;;  %v1496_v13 = vld [vmem:[%s1974_s1 + $0x84] ss:$8 sps:$4 sm:$0xff]   ;;  %v1498_v14 = vld [vmem:[%s1974_s1 + $0x80] ss:$8 sps:$4 sm:$0xff]  }
  0x1e   : > { %v1499_v15 = vld [vmem:[%s1974_s1 + $0x74] ss:$8 sps:$4 sm:$0xff]   ;;  %v1504_v16 = vld [vmem:[%s1974_s1 + $0x64] ss:$8 sps:$4 sm:$0x3f]   ;;  %vm374_vm1 = vcmask 883712  }
  0x1f   : > { %v1506_v17 = vld [vmem:[%s1974_s1 + $0x60] ss:$8 sps:$4 sm:$0x3f]   ;;  %v1507_v18 = vld [vmem:[%s1974_s1 + $0x144] ss:$8 sps:$4 sm:$0x3f]  }
  0x20   : > { %411 = vmatpush1.bf16.msra.mxu0 %v1486_v6  ;;  %1431 = vmatpush1.bf16.msra.mxu1 %v1486_v6  ;;  %v1501_v19 = vld [vmem:[%s1974_s1 + $0x70] ss:$8 sps:$4 sm:$0xff]   ;;  %v1509_v20 = vld [vmem:[%s1974_s1 + $0x140] ss:$8 sps:$4 sm:$0x3f]   ;;  %v596_v23 = vsel %vm399_vm0, %v1506_v17, 0 }
  0x21   : > { %412 = vmatprep.subr.bf16.mxu0 %v1487_v7  ;;  %1425 = vmatprep.subr.bf16.mxu1 %v1487_v7  ;;  %v1736_v22 = vld [vmem:[%s1667_s4 + $0x28] sm:$0xff]   ;;  %v878_v24 = vsel %vm399_vm0, %v1509_v20, 0  ;;  %v1512_v25 = vld [vmem:[%s1974_s1 + $0x54] ss:$8 sps:$4 sm:$0xff]   ;;  %v1510_v27 = vld [vmem:[%s1974_s1 + $0x50] ss:$8 sps:$4 sm:$0xff]  }
  0x22   : > { %v1515_v26 = vld [vmem:[%s1974_s1 + $0x134] ss:$8 sps:$4 sm:$0xff]   ;;  %v1513_v28 = vld [vmem:[%s1974_s1 + $0x130] ss:$8 sps:$4 sm:$0xff]   ;;  %v1520_v29 = vld [vmem:[%s1974_s1 + $0x44] ss:$8 sps:$4 sm:$0xff]  }
  0x23   : > { %v1523_v30 = vld [vmem:[%s1974_s1 + $0x124] ss:$8 sps:$4 sm:$0xff]   ;;  %v1767_v31 = vld [vmem:[%s1667_s4 + $0x10] sm:$0xff]   ;;  %v1518_v33 = vld [vmem:[%s1974_s1 + $0x40] ss:$8 sps:$4 sm:$0xff]  }
  0x24   : > { %413 = vmatpush1.bf16.msra.mxu0 %v1489_v8  ;;  %1432 = vmatpush1.bf16.msra.mxu1 %v1489_v8  ;;  %v1770_v32 = vld [vmem:[%s1667_s4 + $0x30] sm:$0xff]   ;;  %v1521_v34 = vld [vmem:[%s1974_s1 + $0x120] ss:$8 sps:$4 sm:$0xff]   ;;  %v1534_v39 = vld [vmem:[%s1974_s1 + $0x24] ss:$8 sps:$4 sm:$0xff]  }
  0x25   : > { %414 = vmatprep.subr.bf16.mxu0 %v1490_v9  ;;  %1426 = vmatprep.subr.bf16.mxu1 %v1490_v9  ;;  %v1526_v35 = vld [vmem:[%s1974_s1 + $0x34] ss:$8 sps:$4 sm:$0xff]   ;;  %v1524_v36 = vld [vmem:[%s1974_s1 + $0x30] ss:$8 sps:$4 sm:$0xff]   ;;  %v1537_v41 = vld [vmem:[%s1974_s1 + $0x104] ss:$8 sps:$4 sm:$0xff]  }
  0x26   : > { %v1531_v37 = vld [vmem:[%s1974_s1 + $0x114] ss:$8 sps:$4 sm:$0xff]   ;;  %v1529_v38 = vld [vmem:[%s1974_s1 + $0x110] ss:$8 sps:$4 sm:$0xff]   ;;  %v1532_v43 = vld [vmem:[%s1974_s1 + $0x20] ss:$8 sps:$4 sm:$0xff]  }
  0x27   : > { %v1527_v40 = vld [vmem:[%s1667_s4 + $0x18] sm:$0xff]   ;;  %v1535_v44 = vld [vmem:[%s1974_s1 + $0x100] ss:$8 sps:$4 sm:$0xff]   ;;  %v1548_v49 = vld [vmem:[%s1974_s1 + $0x4] ss:$8 sps:$4 sm:$0xff]  }
  0x28   : > { %415 = vmatpush1.bf16.msra.mxu0 %v1492_v10  ;;  %1433 = vmatpush1.bf16.msra.mxu1 %v1492_v10  ;;  %v1804_v42 = vld [vmem:[%s1667_s4 + $0x38] sm:$0xff]   ;;  %v1551_v50 = vld [vmem:[%s1974_s1 + $0xe4] ss:$8 sps:$4 sm:$0xff]   ;;  %v1546_v53 = vld [vmem:[%s1974_s1] ss:$8 sps:$4 sm:$0xff]  }
  0x29   : > { %416 = vmatprep.subr.bf16.mxu0 %v1493_v11  ;;  %1427 = vmatprep.subr.bf16.mxu1 %v1493_v11  ;;  %v1540_v45 = vld [vmem:[%s1974_s1 + $0x14] ss:$8 sps:$4 sm:$0xff]   ;;  %v1538_v47 = vld [vmem:[%s1974_s1 + $0x10] ss:$8 sps:$4 sm:$0xff]   ;;  %v1541_v51 = vld [vmem:[%s1667_s4 + $0x20] sm:$0xff]  }
  0x2a   : > { %v1545_v46 = vld [vmem:[%s1974_s1 + $0xf4] ss:$8 sps:$4 sm:$0xff]   ;;  %v1543_v48 = vld [vmem:[%s1974_s1 + $0xf0] ss:$8 sps:$4 sm:$0xff]   ;;  %v1542_v52 = vld [vmem:[%s1667_s4 + $0x40] sm:$0xff]  }
  0x2b   : > { %v1549_v54 = vld [vmem:[%s1974_s1 + $0xe0] ss:$8 sps:$4 sm:$0xff]   ;;  %v1553_v56 = vld [vmem:[%s1667_s4 + $0x10] sm:$0xff]   ;;  %v1554_v57 = vld [vmem:[%s1667_s4 + $0x18] sm:$0xff]  }
  0x2c   : > { %417 = vmatpush1.bf16.msra.mxu0 %v1495_v12  ;;  %1434 = vmatpush1.bf16.msra.mxu1 %v1495_v12  ;;  %v1552_v55 = vld [vmem:[%s1667_s4] sm:$0xff]   ;;  %v1556_v59 = vld [vmem:[%s1667_s4 + $0x28] sm:$0xff]   ;;  %v1557_v60 = vld [vmem:[%s1667_s4 + $0x30] sm:$0xff]  }
  0x2d   : > { %418 = vmatprep.subr.bf16.mxu0 %v1496_v13  ;;  %1428 = vmatprep.subr.bf16.mxu1 %v1496_v13  ;;  %v1555_v58 = vld [vmem:[%s1667_s4 + $0x20] sm:$0xff]   ;;  %v1558_v61 = vld [vmem:[%s1667_s4 + $0x38] sm:$0xff]   ;;  %v1560_v63 = vld [vmem:[%s1667_s4 + $0x48] sm:$0xff]  }
  0x2e   : > { %v1559_v62 = vld [vmem:[%s1667_s4 + $0x40] sm:$0xff]  }
  0x30   : > { %419 = vmatpush1.bf16.msra.mxu0 %v1498_v14  ;;  %1435 = vmatpush1.bf16.msra.mxu1 %v1498_v14 }
  0x31   : > { %420 = vmatprep.subr.bf16.mxu0 %v1499_v15  ;;  %1429 = vmatprep.subr.bf16.mxu1 %v1499_v15 }
  0x34   : > { %421 = vmatpush1.bf16.msra.mxu0 %v1501_v19  ;;  %1436 = vmatpush1.bf16.msra.mxu1 %v1501_v19 }
  0x35   : > { %1365 = vmatprep.subr.msk.bf16.mxu1 %vm399_vm0, %v1504_v16  ;;  %1410 = vmatprep.subr.msk.bf16.mxu0 %vm399_vm0, %v1507_v18 }
  0x37   : > { %1342 = vmatmul.mubr.msk.bf16.vlgmr.msra.gmra.mxu0 %vm374_vm1, %v1733_v21  ;;  %1346 = vmatmul.mubr.msk.bf16.vlgmr.msra.gmra.mxu1 %vm374_vm1, %v1736_v22 }
  0x38   : > { %604 = vmatpush1.bf16.msra.mxu1 %v596_v23  ;;  %886 = vmatpush1.bf16.msra.mxu0 %v878_v24 }
  0x39   : > { %605 = vmatprep.subr.bf16.mxu1 %v1512_v25  ;;  %448 = vmatprep.mubr.bf16.mxu0 %v1602_v5 }
  0x3a   : > { %488 = vmatprep.mubr.bf16.mxu1 %v1602_v5  ;;  %887 = vmatprep.subr.bf16.mxu0 %v1515_v26 }
  0x3c   : > { %606 = vmatpush1.bf16.msra.mxu1 %v1510_v27  ;;  %888 = vmatpush1.bf16.msra.mxu0 %v1513_v28 }
  0x3d   : > { %607 = vmatprep.subr.bf16.mxu1 %v1520_v29  ;;  %889 = vmatprep.subr.bf16.mxu0 %v1523_v30 }
  0x3f   : > { %1343 = vmatmul.mubr.msk.bf16.gmra.mxu0 %vm374_vm1, %v1767_v31  ;;  %1347 = vmatmul.mubr.msk.bf16.gmra.mxu1 %vm374_vm1, %v1770_v32 }
  0x40   : > { %608 = vmatpush1.bf16.msra.mxu1 %v1518_v33  ;;  %890 = vmatpush1.bf16.msra.mxu0 %v1521_v34 }
  0x41   : > { %609 = vmatprep.subr.bf16.mxu1 %v1526_v35  ;;  %458 = vmatprep.mubr.bf16.mxu0 %v1602_v5 }
  0x42   : > { %498 = vmatprep.mubr.bf16.mxu1 %v1602_v5  ;;  %891 = vmatprep.subr.bf16.mxu0 %v1531_v37 }
  0x44   : > { %610 = vmatpush1.bf16.msra.mxu1 %v1524_v36  ;;  %892 = vmatpush1.bf16.msra.mxu0 %v1529_v38 }
  0x45   : > { %611 = vmatprep.subr.bf16.mxu1 %v1534_v39  ;;  %893 = vmatprep.subr.bf16.mxu0 %v1537_v41 }
  0x47   : > { %1344 = vmatmul.mubr.msk.bf16.gmra.mxu0 %vm374_vm1, %v1527_v40  ;;  %1348 = vmatmul.mubr.msk.bf16.gmra.mxu1 %vm374_vm1, %v1804_v42 }
  0x48   : > { %612 = vmatpush1.bf16.msra.mxu1 %v1532_v43  ;;  %894 = vmatpush1.bf16.msra.mxu0 %v1535_v44 }
  0x49   : > { %468 = vmatprep.mubr.bf16.mxu0 %v1602_v5  ;;  %508 = vmatprep.mubr.bf16.mxu1 %v1602_v5 }
  0x4a   : > { %613 = vmatprep.subr.bf16.mxu1 %v1540_v45  ;;  %895 = vmatprep.subr.bf16.mxu0 %v1545_v46 }
  0x4c   : > { %614 = vmatpush1.bf16.msra.mxu1 %v1538_v47  ;;  %896 = vmatpush1.bf16.msra.mxu0 %v1543_v48 }
  0x4d   : > { %615 = vmatprep.subr.bf16.mxu1 %v1548_v49  ;;  %897 = vmatprep.subr.bf16.mxu0 %v1551_v50 }
  0x4f   : > { %1345 = vmatmul.mubr.msk.bf16.gmra.mxu0 %vm374_vm1, %v1541_v51  ;;  %1349 = vmatmul.mubr.msk.bf16.gmra.mxu1 %vm374_vm1, %v1542_v52 }
  0x50   : > { %616 = vmatpush1.bf16.msra.mxu1 %v1546_v53  ;;  %898 = vmatpush1.bf16.msra.mxu0 %v1549_v54 }
  0x51   : > { %633 = vmatprep.mubr.bf16.mxu1 %v1602_v5  ;;  %915 = vmatprep.mubr.bf16.mxu0 %v1602_v5 }
  0x57   : > { %1366 = vmatmul.mubr.msk.bf16.vlgmr.msra.gmra.mxu1 %vm374_vm1, %v1552_v55  ;;  %1411 = vmatmul.mubr.msk.bf16.vlgmr.msra.gmra.mxu0 %vm374_vm1, %v1553_v56 }
  0x58   : > { %643 = vmatprep.mubr.bf16.mxu1 %v1602_v5  ;;  %925 = vmatprep.mubr.bf16.mxu0 %v1602_v5 }
  0x5f   : > { %1367 = vmatmul.mubr.msk.bf16.gmra.mxu1 %vm374_vm1, %v1733_v21  ;;  %1412 = vmatmul.mubr.msk.bf16.gmra.mxu0 %vm374_vm1, %v1554_v57 }
  0x60   : > { %653 = vmatprep.mubr.bf16.mxu1 %v1602_v5  ;;  %935 = vmatprep.mubr.bf16.mxu0 %v1602_v5 }
  0x67   : > { %1368 = vmatmul.mubr.msk.bf16.gmra.mxu1 %vm374_vm1, %v1767_v31  ;;  %1413 = vmatmul.mubr.msk.bf16.gmra.mxu0 %vm374_vm1, %v1555_v58 }
  0x68   : > { %663 = vmatprep.mubr.bf16.mxu1 %v1602_v5  ;;  %945 = vmatprep.mubr.bf16.mxu0 %v1602_v5 }
  0x6f   : > { %1369 = vmatmul.mubr.msk.bf16.gmra.mxu1 %vm374_vm1, %v1527_v40  ;;  %1414 = vmatmul.mubr.msk.bf16.gmra.mxu0 %vm374_vm1, %v1556_v59 }
  0x70   : > { %673 = vmatprep.mubr.bf16.mxu1 %v1602_v5  ;;  %955 = vmatprep.mubr.bf16.mxu0 %v1602_v5 }
  0x77   : > { %1370 = vmatmul.mubr.msk.bf16.gmra.mxu1 %vm374_vm1, %v1541_v51  ;;  %1415 = vmatmul.mubr.msk.bf16.gmra.mxu0 %vm374_vm1, %v1557_v60 }
  0x78   : > { %683 = vmatprep.mubr.bf16.mxu1 %v1602_v5  ;;  %965 = vmatprep.mubr.bf16.mxu0 %v1602_v5 }
  0x7f   : > { %1371 = vmatmul.mubr.msk.bf16.gmra.mxu1 %vm374_vm1, %v1736_v22  ;;  %1416 = vmatmul.mubr.msk.bf16.gmra.mxu0 %vm374_vm1, %v1558_v61 }
  0x80   : > { %693 = vmatprep.mubr.bf16.mxu1 %v1602_v5  ;;  %975 = vmatprep.mubr.bf16.mxu0 %v1602_v5 }
  0x87   : > { %1372 = vmatmul.mubr.msk.bf16.gmra.mxu1 %vm374_vm1, %v1770_v32  ;;  %1417 = vmatmul.mubr.msk.bf16.gmra.mxu0 %vm374_vm1, %v1559_v62 }
  0x88   : > { %703 = vmatprep.mubr.bf16.mxu1 %v1602_v5  ;;  %985 = vmatprep.mubr.bf16.mxu0 %v1602_v5 }
  0x8f   : > { %1373 = vmatmul.mubr.msk.bf16.gmra.mxu1 %vm374_vm1, %v1804_v42  ;;  %1418 = vmatmul.mubr.msk.bf16.gmra.mxu0 %vm374_vm1, %v1560_v63 }
  0xf7   : > { %v440_v0 = vpop.f32.mrf.mxu0  ;;  %v1891_v1 = vpop.f32.mrf.mxu1 }
  0xf9   : > { %v442_v2 = vpop.f32.mrf.mxu0  ;;  %v1893_v3 = vpop.f32.mrf.mxu1 }
  0xfb   : > { %v444_v4 = vpop.f32.mrf.mxu0  ;;  %v1895_v6 = vpop.f32.mrf.mxu1 }
  0xfd   : > { %v446_v7 = vpop.f32.mrf.mxu0  ;;  %v1897_v8 = vpop.f32.mrf.mxu1 }
  0xff   : > { %v450_v9 = vpop.f32.mrf.mxu0  ;;  %v1899_v5 = vpop.f32.mrf.mxu1 }
 0x101   : > { %v452_v10 = vpop.f32.mrf.mxu0  ;;  %v1901_v11 = vpop.f32.mrf.mxu1 }
 0x103   : > { %v454_v12 = vpop.f32.mrf.mxu0  ;;  %v1903_v13 = vpop.f32.mrf.mxu1 }
 0x105   : > { %v456_v14 = vpop.f32.mrf.mxu0  ;;  %v1905_v15 = vpop.f32.mrf.mxu1 }
 0x107   : > { %v460_v16 = vpop.f32.mrf.mxu0  ;;  %v1907_v17 = vpop.f32.mrf.mxu1 }
 0x109   : > { %v462_v18 = vpop.f32.mrf.mxu0  ;;  %v1909_v19 = vpop.f32.mrf.mxu1 }
 0x10b   : > { %v464_v20 = vpop.f32.mrf.mxu0  ;;  %v1911_v21 = vpop.f32.mrf.mxu1 }
 0x10d   : > { %v1913_v22 = vpop.f32.mrf.mxu0  ;;  %v1915_v23 = vpop.f32.mrf.mxu1 }
 0x10f   : > { %v1917_v24 = vpop.f32.mrf.mxu0  ;;  %v1919_v25 = vpop.f32.mrf.mxu1 }
 0x111   : > { %v1921_v26 = vpop.f32.mrf.mxu0  ;;  %v1923_v27 = vpop.f32.mrf.mxu1 }
 0x113   : > { %v1925_v28 = vpop.f32.mrf.mxu0  ;;  %v1927_v29 = vpop.f32.mrf.mxu1 }
 0x115   : > { %v1929_v30 = vpop.f32.mrf.mxu0  ;;  %v1931_v31 = vpop.f32.mrf.mxu1 }
 0x116   : > { %1977 = vst [vmem:[#allocation2_spill] sm:$0xff] %v1931_v31 }
 0x117   : > { %v635_v32 = vpop.f32.mrf.mxu1  ;;  %v917_v33 = vpop.f32.mrf.mxu0 }
 0x118   : > { %v636_v47 = vadd.f32 %v635_v32, %v440_v0 }
 0x119   : > { %v637_v34 = vpop.f32.mrf.mxu1  ;;  %v919_v35 = vpop.f32.mrf.mxu0 }
 0x11a   : > { %v638_v52 = vadd.f32 %v637_v34, %v442_v2  ;;  %v996_v57 = vadd.f32 %v917_v33, %v636_v47 }
 0x11b   : > { %v639_v36 = vpop.f32.mrf.mxu1  ;;  %v921_v37 = vpop.f32.mrf.mxu0 }
 0x11c   : > { %v640_v44 = vadd.f32 %v639_v36, %v444_v4  ;;  %v997_v4 = vadd.f32 %v919_v35, %v638_v52  ;;  %v1097_v32 = vmul.f32 %v996_v57, %v996_v57 }
 0x11d   : > { %v641_v38 = vpop.f32.mrf.mxu1  ;;  %v923_v39 = vpop.f32.mrf.mxu0 }
 0x11e   : > { %v642_v49 = vadd.f32 %v641_v38, %v446_v7  ;;  %v998_v53 = vadd.f32 %v921_v37, %v640_v44 }
 0x11f   : > { %v645_v40 = vpop.f32.mrf.mxu1  ;;  %v927_v41 = vpop.f32.mrf.mxu0 }
 0x120   : > { %v646_v48 = vadd.f32 %v645_v40, %v450_v9  ;;  %v999_v60 = vadd.f32 %v923_v39, %v642_v49  ;;  %v1099_v36 = vmul.f32 %v998_v53, %v998_v53  ;;  %v1029_v39 = vadd.f32 %v998_v53, %v996_v57 }
 0x121   : > { %v647_v42 = vpop.f32.mrf.mxu1  ;;  %v929_v43 = vpop.f32.mrf.mxu0 }
 0x122   : > { %v1000_v58 = vadd.f32 %v927_v41, %v646_v48  ;;  %v648_v59 = vadd.f32 %v647_v42, %v452_v10  ;;  %v1098_v10 = vmul.f32 %v997_v4, %v997_v4  ;;  %v1050_v44 = vadd.f32 %v999_v60, %v997_v4 }
 0x123   : > { %v649_v45 = vpop.f32.mrf.mxu1  ;;  %v931_v46 = vpop.f32.mrf.mxu0 }
 0x124   : > { %v650_v54 = vadd.f32 %v649_v45, %v454_v12  ;;  %v1101_v38 = vmul.f32 %v1000_v58, %v1000_v58  ;;  %v1001_v2 = vadd.f32 %v929_v43, %v648_v59  ;;  %v1100_v12 = vmul.f32 %v999_v60, %v999_v60 }
 0x125   : > { %v651_v50 = vpop.f32.mrf.mxu1  ;;  %v933_v51 = vpop.f32.mrf.mxu0  ;;  %v1030_v48 = vadd.f32 %v1029_v39, %v1000_v58 }
 0x126   : > { %v1002_v31 = vadd.f32 %v931_v46, %v650_v54  ;;  %v652_v0 = vadd.f32 %v651_v50, %v456_v14  ;;  %v1102_v43 = vmul.f32 %v1001_v2, %v1001_v2  ;;  %v1150_v50 = vadd.f32 %v1100_v12, %v1098_v10 }
 0x127   : > { %v655_v55 = vpop.f32.mrf.mxu1  ;;  %v937_v56 = vpop.f32.mrf.mxu0  ;;  %v1051_v53 = vadd.f32 %v1050_v44, %v1001_v2 }
 0x128   : > { %v656_v61 = vadd.f32 %v655_v55, %v460_v16  ;;  %v1129_v16 = vadd.f32 %v1099_v36, %v1097_v32  ;;  %v1103_v42 = vmul.f32 %v1002_v31, %v1002_v31  ;;  %v1003_v35 = vadd.f32 %v933_v51, %v652_v0 }
 0x129   : > { %v657_v62 = vpop.f32.mrf.mxu1  ;;  %v939_v63 = vpop.f32.mrf.mxu0  ;;  %v1151_v4 = vadd.f32 %v1150_v50, %v1102_v43 }
 0x12a   : > { %v1004_v37 = vadd.f32 %v937_v56, %v656_v61  ;;  %v658_v40 = vadd.f32 %v657_v62, %v462_v18  ;;  %v1130_v49 = vadd.f32 %v1129_v16, %v1101_v38  ;;  %v1031_v56 = vadd.f32 %v1030_v48, %v1002_v31 }
 0x12b   : > { %v659_v9 = vpop.f32.mrf.mxu1  ;;  %v941_v7 = vpop.f32.mrf.mxu0  ;;  %v1104_v51 = vmul.f32 %v1003_v35, %v1003_v35  ;;  %v1052_v0 = vadd.f32 %v1051_v53, %v1003_v35 }
 0x12c   : > { %v660_v34 = vadd.f32 %v659_v9, %v464_v20  ;;  %v1105_v18 = vmul.f32 %v1004_v37, %v1004_v37  ;;  %v1005_v52 = vadd.f32 %v939_v63, %v658_v40  ;;  %v1131_v57 = vadd.f32 %v1130_v49, %v1103_v42 }
 0x12d   : > { %v661_v33 = vpop.f32.mrf.mxu1  ;;  %v943_v41 = vpop.f32.mrf.mxu0  ;;  %v1032_v36 = vadd.f32 %v1031_v56, %v1004_v37  ;;  %v1152_v40 = vadd.f32 %v1151_v4, %v1104_v51 }
 0x12e   : > { %v1006_v45 = vadd.f32 %v941_v7, %v660_v34  ;;  %v662_v14 = vadd.f32 %v661_v33, %v1913_v22  ;;  %v1132_v9 = vadd.f32 %v1131_v57, %v1105_v18  ;;  %v1106_v63 = vmul.f32 %v1005_v52, %v1005_v52 }
 0x12f   : > { %v665_v46 = vpop.f32.mrf.mxu1  ;;  %v947_v47 = vpop.f32.mrf.mxu0  ;;  %v1053_v33 = vadd.f32 %v1052_v0, %v1005_v52 }
 0x130   : > { %v666_v20 = vadd.f32 %v665_v46, %v1917_v24  ;;  %v1107_v60 = vmul.f32 %v1006_v45, %v1006_v45  ;;  %v1007_v61 = vadd.f32 %v943_v41, %v662_v14  ;;  %v1033_v31 = vadd.f32 %v1032_v36, %v1006_v45 }
 0x131   : > { %v667_v54 = vpop.f32.mrf.mxu1  ;;  %v949_v55 = vpop.f32.mrf.mxu0  ;;  %v1153_v44 = vadd.f32 %v1152_v40, %v1106_v63 }
 0x132   : > { %v1008_v59 = vadd.f32 %v947_v47, %v666_v20  ;;  %v668_v22 = vadd.f32 %v667_v54, %v1921_v26  ;;  %v1133_v26 = vadd.f32 %v1132_v9, %v1107_v60  ;;  %v1108_v41 = vmul.f32 %v1007_v61, %v1007_v61 }
 0x133   : > { %v669_v62 = vpop.f32.mrf.mxu1  ;;  %v951_v58 = vpop.f32.mrf.mxu0  ;;  %v1054_v35 = vadd.f32 %v1053_v33, %v1007_v61 }
 0x134   : > { %v670_v24 = vadd.f32 %v669_v62, %v1925_v28  ;;  %v1009_v7 = vadd.f32 %v949_v55, %v668_v22  ;;  %v1109_v2 = vmul.f32 %v1008_v59, %v1008_v59  ;;  %v1034_v37 = vadd.f32 %v1033_v31, %v1008_v59 }
 0x135   : > { %v671_v32 = vpop.f32.mrf.mxu1  ;;  %v953_v38 = vpop.f32.mrf.mxu0 }
 0x136   : > { %v1010_v34 = vadd.f32 %v951_v58, %v670_v24  ;;  %v672_v12 = vadd.f32 %v671_v32, %v1929_v30  ;;  %v1110_v14 = vmul.f32 %v1009_v7, %v1009_v7  ;;  %v1134_v47 = vadd.f32 %v1133_v26, %v1109_v2 }
 0x137   : > { %v675_v10 = vpop.f32.mrf.mxu1  ;;  %v957_v39 = vpop.f32.mrf.mxu0  ;;  %v1154_v30 = vadd.f32 %v1153_v44, %v1108_v41  ;;  %v1055_v43 = vadd.f32 %v1054_v35, %v1009_v7 }
 0x138   : > { %v1111_v16 = vmul.f32 %v1010_v34, %v1010_v34  ;;  %v1011_v28 = vadd.f32 %v953_v38, %v672_v12  ;;  %v676_v42 = vadd.f32 %v675_v10, %v1891_v1  ;;  %v1035_v48 = vadd.f32 %v1034_v37, %v1010_v34 }
 0x139   : > { %v677_v46 = vpop.f32.mrf.mxu1  ;;  %v959_v45 = vpop.f32.mrf.mxu0  ;;  %v1155_v56 = vadd.f32 %v1154_v30, %v1110_v14 }
 0x13a   : > { %v1012_v49 = vadd.f32 %v957_v39, %v676_v42  ;;  %v1112_v20 = vmul.f32 %v1011_v28, %v1011_v28  ;;  %v678_v50 = vadd.f32 %v677_v46, %v1893_v3  ;;  %v1135_v54 = vadd.f32 %v1134_v47, %v1111_v16 }
 0x13b   : > { %v679_v18 = vpop.f32.mrf.mxu1  ;;  %v961_v52 = vpop.f32.mrf.mxu0  ;;  %v1056_v57 = vadd.f32 %v1055_v43, %v1011_v28 }
 0x13c   : > { %v1036_v55 = vadd.f32 %v1035_v48, %v1012_v49  ;;  %v1113_v53 = vmul.f32 %v1012_v49, %v1012_v49  ;;  %v680_v1 = vadd.f32 %v679_v18, %v1895_v6  ;;  %v1013_v59 = vadd.f32 %v959_v45, %v678_v50 }
 0x13d   : > { %v681_v51 = vpop.f32.mrf.mxu1  ;;  %v963_v60 = vpop.f32.mrf.mxu0  ;;  %v1156_v58 = vadd.f32 %v1155_v56, %v1112_v20 }
 0x13e   : > { %v1136_v61 = vadd.f32 %v1135_v54, %v1113_v53  ;;  %v1014_v22 = vadd.f32 %v961_v52, %v680_v1  ;;  %v682_v62 = vadd.f32 %v681_v51, %v1897_v8  ;;  %v1057_v4 = vadd.f32 %v1056_v57, %v1013_v59 }
 0x13f   : > { %v1114_v36 = vmul.f32 %v1013_v59, %v1013_v59  ;;  %v685_v3 = vpop.f32.mrf.mxu1  ;;  %v967_v24 = vpop.f32.mrf.mxu0 }
 0x140   : > { %v1037_v0 = vadd.f32 %v1036_v55, %v1014_v22  ;;  %v1115_v9 = vmul.f32 %v1014_v22, %v1014_v22  ;;  %v1015_v63 = vadd.f32 %v963_v60, %v682_v62  ;;  %v686_v7 = vadd.f32 %v685_v3, %v1899_v5 }
 0x141   : > { %v1157_v6 = vadd.f32 %v1156_v58, %v1114_v36  ;;  %v687_v32 = vpop.f32.mrf.mxu1  ;;  %v969_v38 = vpop.f32.mrf.mxu0 }
 0x142   : > { %v1137_v31 = vadd.f32 %v1136_v61, %v1115_v9  ;;  %v1058_v2 = vadd.f32 %v1057_v4, %v1015_v63  ;;  %v1116_v34 = vmul.f32 %v1015_v63, %v1015_v63  ;;  %v1016_v12 = vadd.f32 %v967_v24, %v686_v7 }
 0x143   : > { %v688_v40 = vadd.f32 %v687_v32, %v1901_v11  ;;  %v689_v8 = vpop.f32.mrf.mxu1  ;;  %v971_v33 = vpop.f32.mrf.mxu0 }
 0x144   : > { %v1158_v26 = vadd.f32 %v1157_v6, %v1116_v34  ;;  %v1038_v41 = vadd.f32 %v1037_v0, %v1016_v12  ;;  %v1117_v10 = vmul.f32 %v1016_v12, %v1016_v12  ;;  %v690_v39 = vadd.f32 %v689_v8, %v1903_v13 }
 0x145   : > { %v1017_v37 = vadd.f32 %v969_v38, %v688_v40  ;;  %v691_v16 = vpop.f32.mrf.mxu1  ;;  %v973_v28 = vpop.f32.mrf.mxu0 }
 0x146   : > { %v1138_v5 = vadd.f32 %v1137_v31, %v1117_v10  ;;  %v1018_v42 = vadd.f32 %v971_v33, %v690_v39  ;;  %v692_v44 = vadd.f32 %v691_v16, %v1905_v15  ;;  %v1978_v10 = vld [vmem:[#allocation2_spill] sm:$0xff] }
 0x147   : > { %v1059_v35 = vadd.f32 %v1058_v2, %v1017_v37  ;;  %v1118_v14 = vmul.f32 %v1017_v37, %v1017_v37  ;;  %v695_v46 = vpop.f32.mrf.mxu1  ;;  %v977_v45 = vpop.f32.mrf.mxu0 }
 0x148   : > { %v1039_v47 = vadd.f32 %v1038_v41, %v1018_v42  ;;  %v1119_v11 = vmul.f32 %v1018_v42, %v1018_v42  ;;  %v1019_v48 = vadd.f32 %v973_v28, %v692_v44  ;;  %v696_v49 = vadd.f32 %v695_v46, %v1907_v17 }
 0x149   : > { %v1159_v30 = vadd.f32 %v1158_v26, %v1118_v14  ;;  %v697_v43 = vpop.f32.mrf.mxu1  ;;  %v979_v20 = vpop.f32.mrf.mxu0 }
 0x14a   : > { %v1139_v13 = vadd.f32 %v1138_v5, %v1119_v11  ;;  %v1060_v50 = vadd.f32 %v1059_v35, %v1019_v48  ;;  %v1120_v18 = vmul.f32 %v1019_v48, %v1019_v48  ;;  %v1020_v52 = vadd.f32 %v977_v45, %v696_v49 }
 0x14b   : > { %v698_v54 = vadd.f32 %v697_v43, %v1909_v19  ;;  %v699_v55 = vpop.f32.mrf.mxu1  ;;  %v981_v15 = vpop.f32.mrf.mxu0  ;;  %v1603_v49 = vmov 1966171168   ;;  %v1077_v43 = vlaneseq }
 0x14c   : > { %v1160_v53 = vadd.f32 %v1159_v30, %v1120_v18  ;;  %v1040_v1 = vadd.f32 %v1039_v47, %v1020_v52  ;;  %v1121_v56 = vmul.f32 %v1020_v52, %v1020_v52  ;;  %v700_v57 = vadd.f32 %v699_v55, %v1911_v21 }
 0x14d   : > { %v1021_v59 = vadd.f32 %v979_v20, %v698_v54  ;;  %v701_v51 = vpop.f32.mrf.mxu1  ;;  %v983_v60 = vpop.f32.mrf.mxu0  ;;  %v1075_v30 = vunpack.c.l.s4 %v1603_v49  ;;  %vm1092_vm2 = vcmp.lt.s32.totalorder %v1077_v43, 256 }
 0x14e   : > { %v1140_v17 = vadd.f32 %v1139_v13, %v1121_v56  ;;  %v1022_v61 = vadd.f32 %v981_v15, %v700_v57  ;;  %v702_v22 = vadd.f32 %v701_v51, %v1915_v23 }
 0x14f   : > { %v1061_v62 = vadd.f32 %v1060_v50, %v1021_v59  ;;  %v1122_v58 = vmul.f32 %v1021_v59, %v1021_v59  ;;  %v705_v4 = vpop.f32.mrf.mxu1  ;;  %v987_v36 = vpop.f32.mrf.mxu0 }
 0x150   : > { %v1041_v3 = vadd.f32 %v1040_v1, %v1022_v61  ;;  %v1123_v19 = vmul.f32 %v1022_v61, %v1022_v61  ;;  %v1023_v24 = vadd.f32 %v983_v60, %v702_v22  ;;  %v706_v0 = vadd.f32 %v705_v4, %v1919_v25 }
 0x151   : > { %v1161_v9 = vadd.f32 %v1160_v53, %v1122_v58  ;;  %v707_v63 = vpop.f32.mrf.mxu1  ;;  %v989_v7 = vpop.f32.mrf.mxu0  ;;  %v1076_v53 = vunpack.c.0.s8 %v1075_v30  ;;  %v1078_v1 = vshrl.u32 %v1077_v43, 7 }
 0x152   : > { %v1141_v21 = vadd.f32 %v1140_v17, %v1123_v19  ;;  %v1062_v6 = vadd.f32 %v1061_v62, %v1023_v24  ;;  %v1124_v32 = vmul.f32 %v1023_v24, %v1023_v24  ;;  %v1024_v38 = vadd.f32 %v987_v36, %v706_v0 }
 0x153   : > { %v708_v31 = vadd.f32 %v707_v63, %v1923_v27  ;;  %v709_v2 = vpop.f32.mrf.mxu1  ;;  %v991_v23 = vpop.f32.mrf.mxu0  ;;  %v1079_v58 = vsub.s32 %v1076_v53, %v1078_v1 }
 0x154   : > { %v1162_v34 = vadd.f32 %v1161_v9, %v1124_v32  ;;  %v1042_v12 = vadd.f32 %v1041_v3, %v1024_v38  ;;  %v1125_v40 = vmul.f32 %v1024_v38, %v1024_v38  ;;  %v710_v8 = vadd.f32 %v709_v2, %v1927_v29  ;;  %v1028_v9 = vld [vmem:[%s1657_s25] ss:$8 sm:$0x3] }
 0x155   : > { %v1025_v33 = vadd.f32 %v989_v7, %v708_v31  ;;  %v711_v26 = vpop.f32.mrf.mxu1  ;;  %v993_v28 = vpop.f32.mrf.mxu0 }
 0x156   : > { %v1142_v41 = vadd.f32 %v1141_v21, %v1125_v40  ;;  %v1026_v25 = vadd.f32 %v991_v23, %v710_v8  ;;  %v712_v39 = vadd.f32 %v711_v26, %v1978_v10  ;;  %v1096_v21 = vld [vmem:[%s1662_s28] ss:$8 sm:$0x3] }
 0x157   : > { %v1063_v37 = vadd.f32 %v1062_v6, %v1025_v33  ;;  %v1126_v16 = vmul.f32 %v1025_v33, %v1025_v33 }
 0x158   : > { %v1043_v5 = vadd.f32 %v1042_v12, %v1026_v25  ;;  %v1127_v42 = vmul.f32 %v1026_v25, %v1026_v25  ;;  %v1027_v44 = vadd.f32 %v993_v28, %v712_v39 }
 0x159   : > { %v1163_v27 = vadd.f32 %v1162_v34, %v1126_v16 }
 0x15a   : > { %v1044_v35 = vrot.slane %v1043_v5, 4  ;;  %v1143_v14 = vadd.f32 %v1142_v41, %v1127_v42  ;;  %v1064_v46 = vadd.f32 %v1063_v37, %v1027_v44  ;;  %v1128_v45 = vmul.f32 %v1027_v44, %v1027_v44 }
 0x15c   : > { %v1045_v47 = vadd.f32 %v1044_v35, %v1043_v5  ;;  %v1144_v11 = vrot.slane %v1143_v14, 4  ;;  %v1065_v29 = vrot.slane %v1064_v46, 4  ;;  %v1164_v48 = vadd.f32 %v1163_v27, %v1128_v45 }
 0x15e   : > { %v1046_v20 = vrot.slane %v1045_v47, 2  ;;  %v1145_v13 = vadd.f32 %v1144_v11, %v1143_v14  ;;  %v1066_v50 = vadd.f32 %v1065_v29, %v1064_v46  ;;  %v1165_v18 = vrot.slane %v1164_v48, 4 }
 0x160   : > { %v1047_v52 = vadd.f32 %v1046_v20, %v1045_v47  ;;  %v1146_v54 = vrot.slane %v1145_v13, 2  ;;  %v1067_v55 = vrot.slane %v1066_v50, 2  ;;  %v1166_v15 = vadd.f32 %v1165_v18, %v1164_v48 }
 0x162   : > { %v1048_v56 = vrot.slane %v1047_v52, 1  ;;  %v1147_v57 = vadd.f32 %v1146_v54, %v1145_v13  ;;  %v1068_v59 = vadd.f32 %v1067_v55, %v1066_v50  ;;  %v1167_v51 = vrot.slane %v1166_v15, 2 }
 0x164   : > { %v1148_v60 = vrot.slane %v1147_v57, 1  ;;  %v1069_v17 = vrot.slane %v1068_v59, 1  ;;  %v1168_v61 = vadd.f32 %v1167_v51, %v1166_v15  ;;  %v1049_v22 = vadd.f32 %v1048_v56, %v1047_v52 }
 0x166   : > { %v1070_v62 = vadd.f32 %v1069_v17, %v1068_v59  ;;  %v1169_v4 = vrot.slane %v1168_v61, 1  ;;  %v1149_v36 = vadd.f32 %v1148_v60, %v1147_v57 }
 0x168   : > { %v1073_v3 = vcombine.low %v1049_v22, %v1070_v62  ;;  %v1170_v19 = vadd.f32 %v1169_v4, %v1168_v61 }
 0x16a   : > { %v1080_v24 = vrot.slane %v1073_v3, %v1079_v58  ;;  %v1173_v0 = vcombine.low %v1149_v36, %v1170_v19 }
 0x16c   : > { %v1087_v63 = vrot.slane %v1080_v24, %v1079_v58  ;;  %v1180_v7 = vrot.slane %v1173_v0, %v1079_v58 }
 0x16e   : > { %v1089_v6 = vadd.f32 %v1087_v63, %v1028_v9  ;;  %v1187_v32 = vrot.slane %v1180_v7, %v1079_v58 }
 0x170   : > { %1094 = vst.msk [vmem:[%s1657_s25] ss:$8 sm:$0x3] %vm1092_vm2, %v1089_v6  ;;  %v1189_v38 = vadd.f32 %v1187_v32, %v1096_v21 }
 0x172   : > { %1190 = vst.msk [vmem:[%s1662_s28] ss:$8 sm:$0x3] %vm1092_vm2, %v1189_v38 }
 0x173 PF: > { %s14_s16 = sadd.s32 1, %s1599_s16   ;;  %s1979_s12 = smov %s1591_s14 }
 0x174   : > { %p11_p8 = scmp.ge.s32.totalorder %s14_s16, 6   ;;  %s1980_s13 = smov %s1595_s15 }
 0x175   : > { %s1981_s14 = smov %s1984_s17  ;;  %s1982_s15 = smov %s1988_s18 }
 0x176   :  { %13 = sbr.rel (!%p11_p8) target bundleno = 3 (0x3), region = 76 }

// kernel: conv_lstm_cell.3
= control target key start
LH: loop header
LB: loop body
LE: loop exit
PB: predicated region body
PF: predicated region fallthrough
CT: control target
= control target key end

     0   :  { %s2012_s15 = smov 0   ;;  %s2584_s0 = inlined_call_operand.vmem [shape: bf16[4,160,108], index: 0, kind: input, shape index: {}]   ;;  %s2585_s1 = inlined_call_operand.vmem [shape: bf16[3,108,128], index: 1, kind: input, shape index: {}]   ;;  %s2586_s2 = inlined_call_operand.vmem [shape: f32[1,128], index: 2, kind: input, shape index: {}]   ;;  %s2587_s3 = inlined_call_operand.vmem [shape: f32[4,128,32], index: 3, kind: input, shape index: {}]   ;;  %s2588_s4 = inlined_call_operand.vmem [shape: f32[4,128,64], index: 4, kind: output, shape index: {}]  }
   0x1 LB: > { %s1526_s16 = sadd.s32 4294967295, %s1983_s15   ;;  %p1530_p0 = scmp.ge.s32.totalorder %s1983_s15, 1  ;;  %s1983_s15 = sphi %s2012_s15, %s14_s15  }
   0x2   : > { %p172_p1 = scmp.lt.s32.totalorder %s1983_s15, 5 }
   0x4   : > { %p173_p2 = pnand %p1530_p0, %p172_p1 }
   0x5   : > { %p203_p3 = scmp.lt.s32.totalorder (!%p173_p2), %s1526_s16, 3  ;;  %s1985_s14 = smov (!%p173_p2), 32  }
   0x6   : > { %176 = sbr.rel (%p173_p2) target bundleno = 807 (0x327), region = 36  ;;  %s1986_s22 = smov (!%p173_p2), 64  }
   0xb   : > { %v1811_v0 = vld [vmem:[%s2585_s1 + $0x68] sm:$0x3f]   ;;  %vm372_vm0 = vcmask 1045504   ;;  %v1813_v1 = vld [vmem:[%s2585_s1 + $0x60] sm:$0xff]   ;;  %v1812_v2 = vld [vmem:[%s2585_s1 + $0x30] sm:$0x3f]  }
   0xc   : > { %1796 = vmatprep.subr.msk.bf16.mxu0 %vm372_vm0, %v1811_v0  ;;  %v374_v3 = vsel %vm372_vm0, %v1811_v0, 0  ;;  %v1814_v4 = vld [vmem:[%s2585_s1 + $0x28] sm:$0xff]   ;;  %1797 = vmatprep.subr.msk.bf16.mxu1 %vm372_vm0, %v1812_v2  ;;  %v523_v5 = vsel %vm372_vm0, %v1812_v2, 0  ;;  %v1815_v6 = vld [vmem:[%s2585_s1 + $0x58] sm:$0xff]   ;;  %v1816_v7 = vld [vmem:[%s2585_s1 + $0x20] sm:$0xff]   ;;  %s2590_s16 = smov (!%p203_p3, %s1526_s16), 3 }
   0xd   : > { %1693 = vmatpush3.bf16.msra.mxu0 %v374_v3  ;;  %1723 = vmatpush3.bf16.msra.mxu1 %v523_v5  ;;  %v1817_v8 = vld [vmem:[%s2585_s1 + $0x50] sm:$0xff]   ;;  %s1800_s5 = smul.u32 80, %s2590_s16  ;;  %v1818_v9 = vld [vmem:[%s2585_s1 + $0x18] sm:$0xff]   ;;  %v1819_v10 = vld [vmem:[%s2585_s1 + $0x48] sm:$0xff]   ;;  %vm347_vm1 = vcmask 883712   ;;  %vm1425_vm2 = vcmask 261120  }
   0xe   : > { %1694 = vmatprep.subr.bf16.mxu0 %v1813_v1  ;;  %1724 = vmatprep.subr.bf16.mxu1 %v1814_v4  ;;  %v1820_v11 = vld [vmem:[%s2585_s1 + $0x10] sm:$0xff]   ;;  %v1821_v14 = vld [vmem:[%s2585_s1 + $0x40] sm:$0xff]   ;;  %v1822_v15 = vld [vmem:[%s2585_s1 + $0x8] sm:$0xff]   ;;  %vm1442_vm3 = vcmask 523264  }
   0xf   : > { %s2054_s10 = scalar_lea.vmem %s2584_s0, %s1800_s5  ;;  %v1823_v16 = vld [vmem:[%s2585_s1 + $0x38] sm:$0xff]   ;;  %v1824_v17 = vld [vmem:[%s2585_s1] sm:$0xff]   ;;  %v1832_v23 = vld [vmem:[%s2585_s1 + $0x90] sm:$0xff]   ;;  %s1645_s5 = sshll.u32 %s2590_s16, 7 }
  0x10   : > { %v1825_v12 = vld [vmem:[%s2054_s10 + $0x8] sm:$0xff]   ;;  %v1826_v13 = vld [vmem:[%s2054_s10] sm:$0xff]   ;;  %v1827_v19 = vld [vmem:[%s2054_s10 + $0x10] sm:$0xff]   ;;  %s2107_s11 = scalar_lea.vmem %s2587_s3, %s1645_s5  ;;  %s2515_s25 = scalar_lea.vmem %s2588_s4, %s1645_s5 }
  0x11   : > { %1695 = vmatpush3.bf16.msra.mxu0 %v1813_v1  ;;  %1725 = vmatpush3.bf16.msra.mxu1 %v1814_v4  ;;  %v1828_v18 = vld [vmem:[%s2585_s1 + $0xa0] sm:$0x3f]   ;;  %v1830_v20 = vld [vmem:[%s2054_s10 + $0x18] sm:$0xff]   ;;  %v1834_v25 = vld [vmem:[%s2054_s10 + $0x28] sm:$0xff]  }
  0x12   : > { %1696 = vmatprep.subr.bf16.mxu0 %v1815_v6  ;;  %1726 = vmatprep.subr.bf16.mxu1 %v1816_v7  ;;  %v759_v21 = vsel %vm372_vm0, %v1828_v18, 0  ;;  %v1829_v22 = vld [vmem:[%s2585_s1 + $0x98] sm:$0xff]   ;;  %v1831_v24 = vld [vmem:[%s2054_s10 + $0x20] sm:$0xff]   ;;  %v1833_v26 = vld [vmem:[%s2585_s1 + $0x88] sm:$0xff]  }
  0x13   : > { %1706 = vmatprep.mubr.msk.bf16.mxu0 %vm347_vm1, %v1825_v12  ;;  %1736 = vmatprep.mubr.msk.bf16.mxu1 %vm347_vm1, %v1826_v13  ;;  %v1009_v27 = vld [vmem:[%s2107_s11] sm:$0xff]  ;;  %v1010_v29 = vld [vmem:[%s2107_s11 + $0x8] sm:$0xff]  ;;  %v1835_v30 = vld [vmem:[%s2054_s10 + $0x30] sm:$0xff]  }
  0x14   : > { %v1836_v28 = vld [vmem:[%s2585_s1 + $0x80] sm:$0xff]   ;;  %1041 = vrot.lane.b32.xlu0 %v1009_v27, %s1985_s14  ;;  %v1837_v31 = vld [vmem:[%s2054_s10 + $0x38] sm:$0xff]   ;;  %1043 = vrot.lane.b32.xlu1 %v1010_v29, %s1985_s14 }
  0x15   : > { %1697 = vmatpush3.bf16.msra.mxu0 %v1815_v6  ;;  %1727 = vmatpush3.bf16.msra.mxu1 %v1816_v7  ;;  %v1838_v32 = vld [vmem:[%s2585_s1 + $0x78] sm:$0xff]   ;;  %v1840_v33 = vld [vmem:[%s2585_s1 + $0x70] sm:$0xff]   ;;  %v1839_v34 = vld [vmem:[%s2054_s10 + $0x40] sm:$0xff]  }
  0x16   : > { %1698 = vmatprep.subr.bf16.mxu0 %v1817_v8  ;;  %1728 = vmatprep.subr.bf16.mxu1 %v1818_v9  ;;  %v1841_v35 = vld [vmem:[%s2054_s10 + $0x10] sm:$0xff]   ;;  %v1843_v37 = vld [vmem:[%s2054_s10 + $0x18] sm:$0xff]   ;;  %v1845_v38 = vld [vmem:[%s2054_s10 + $0x20] sm:$0xff]  }
  0x17   : > { %v1842_v36 = vld [vmem:[%s2054_s10 + $0x30] sm:$0xff]   ;;  %v1844_v39 = vld [vmem:[%s2054_s10 + $0x38] sm:$0xff]   ;;  %v1846_v40 = vld [vmem:[%s2054_s10 + $0x40] sm:$0xff]  }
  0x18   : > { %v1847_v41 = vld [vmem:[%s2054_s10 + $0x28] sm:$0xff]   ;;  %v2178_v13 = vld [vmem:[%s2586_s2] ss:$0 sm:$0xff] }
  0x19   : > { %1699 = vmatpush3.bf16.msra.mxu0 %v1817_v8  ;;  %1729 = vmatpush3.bf16.msra.mxu1 %v1818_v9  ;;  %v1848_v42 = vld [vmem:[%s2054_s10 + $0x48] sm:$0xff]  }
  0x1a   : > { %1700 = vmatprep.subr.bf16.mxu0 %v1819_v10  ;;  %1730 = vmatprep.subr.bf16.mxu1 %v1820_v11 }
  0x1d   : > { %1701 = vmatpush3.bf16.msra.mxu0 %v1819_v10  ;;  %1731 = vmatpush3.bf16.msra.mxu1 %v1820_v11 }
  0x1e   : > { %1702 = vmatprep.subr.bf16.mxu0 %v1821_v14  ;;  %1732 = vmatprep.subr.bf16.mxu1 %v1822_v15 }
  0x21   : > { %1703 = vmatpush3.bf16.msra.mxu0 %v1821_v14  ;;  %1733 = vmatpush3.bf16.msra.mxu1 %v1822_v15 }
  0x22   : > { %1704 = vmatprep.subr.bf16.mxu0 %v1823_v16  ;;  %1734 = vmatprep.subr.bf16.mxu1 %v1824_v17 }
  0x25   : > { %1705 = vmatpush3.bf16.msra.mxu0 %v1823_v16  ;;  %1735 = vmatpush3.bf16.msra.mxu1 %v1824_v17 }
  0x26   : > { %1798 = vmatprep.subr.msk.bf16.mxu0 %vm372_vm0, %v1828_v18  ;;  %1799 = vmatprep.subr.msk.bf16.mxu1 %vm372_vm0, %v1828_v18 }
  0x28   : > { %1707 = vmatmul.mubr.msk.bf16.vlgmr.msra.gmra.mxu0 %vm347_vm1, %v1827_v19  ;;  %1737 = vmatmul.mubr.msk.bf16.vlgmr.msra.gmra.mxu1 %vm347_vm1, %v1825_v12 }
  0x29   : > { %1753 = vmatpush3.bf16.msra.mxu0 %v759_v21  ;;  %1710 = vmatprep.mubr.msk.bf16.mxu0 %vm347_vm1, %v1830_v20 }
  0x2a   : > { %1754 = vmatprep.subr.bf16.mxu0 %v1829_v22  ;;  %1789 = vmatpush3.bf16.msra.mxu1 %v759_v21 }
  0x2b   : > { %1740 = vmatprep.mubr.msk.bf16.mxu1 %vm347_vm1, %v1827_v19  ;;  %1783 = vmatprep.subr.bf16.mxu1 %v1829_v22 }
  0x2d   : > { %1755 = vmatpush3.bf16.msra.mxu0 %v1829_v22 }
  0x2e   : > { %1756 = vmatprep.subr.bf16.mxu0 %v1832_v23  ;;  %1790 = vmatpush3.bf16.msra.mxu1 %v1829_v22 }
  0x2f   : > { %1784 = vmatprep.subr.bf16.mxu1 %v1832_v23 }
  0x30   : > { %1711 = vmatmul.mubr.msk.bf16.gmra.mxu0 %vm347_vm1, %v1831_v24  ;;  %1741 = vmatmul.mubr.msk.bf16.gmra.mxu1 %vm347_vm1, %v1830_v20 }
  0x31   : > { %1757 = vmatpush3.bf16.msra.mxu0 %v1832_v23  ;;  %1714 = vmatprep.mubr.msk.bf16.mxu0 %vm347_vm1, %v1834_v25 }
  0x32   : > { %1758 = vmatprep.subr.bf16.mxu0 %v1833_v26  ;;  %1791 = vmatpush3.bf16.msra.mxu1 %v1832_v23 }
  0x33   : > { %1744 = vmatprep.mubr.msk.bf16.mxu1 %vm347_vm1, %v1831_v24  ;;  %1785 = vmatprep.subr.bf16.mxu1 %v1833_v26 }
  0x35   : > { %1759 = vmatpush3.bf16.msra.mxu0 %v1833_v26 }
  0x36   : > { %1760 = vmatprep.subr.bf16.mxu0 %v1836_v28  ;;  %1792 = vmatpush3.bf16.msra.mxu1 %v1833_v26 }
  0x37   : > { %1786 = vmatprep.subr.bf16.mxu1 %v1836_v28 }
  0x38   : > { %1715 = vmatmul.mubr.msk.bf16.gmra.mxu0 %vm347_vm1, %v1835_v30  ;;  %1745 = vmatmul.mubr.msk.bf16.gmra.mxu1 %vm347_vm1, %v1834_v25 }
  0x39   : > { %1761 = vmatpush3.bf16.msra.mxu0 %v1836_v28  ;;  %1718 = vmatprep.mubr.msk.bf16.mxu0 %vm347_vm1, %v1837_v31 }
  0x3a   : > { %1762 = vmatprep.subr.bf16.mxu0 %v1838_v32  ;;  %1793 = vmatpush3.bf16.msra.mxu1 %v1836_v28 }
  0x3b   : > { %1748 = vmatprep.mubr.msk.bf16.mxu1 %vm347_vm1, %v1835_v30  ;;  %1787 = vmatprep.subr.bf16.mxu1 %v1838_v32 }
  0x3d   : > { %1763 = vmatpush3.bf16.msra.mxu0 %v1838_v32 }
  0x3e   : > { %1764 = vmatprep.subr.bf16.mxu0 %v1840_v33  ;;  %1794 = vmatpush3.bf16.msra.mxu1 %v1838_v32 }
  0x3f   : > { %1788 = vmatprep.subr.bf16.mxu1 %v1840_v33 }
  0x40   : > { %1719 = vmatmul.mubr.msk.bf16.gmra.mxu0 %vm347_vm1, %v1839_v34  ;;  %1749 = vmatmul.mubr.msk.bf16.gmra.mxu1 %vm347_vm1, %v1837_v31 }
  0x41   : > { %1765 = vmatpush3.bf16.msra.mxu0 %v1840_v33  ;;  %1766 = vmatprep.mubr.msk.bf16.mxu0 %vm347_vm1, %v1841_v35 }
  0x42   : > { %1795 = vmatpush3.bf16.msra.mxu1 %v1840_v33  ;;  %1774 = vmatprep.mubr.msk.bf16.mxu1 %vm347_vm1, %v1842_v36 }
  0x48   : > { %1767 = vmatmul.mubr.msk.bf16.vlgmr.msra.gmra.mxu0 %vm347_vm1, %v1843_v37  ;;  %1775 = vmatmul.mubr.msk.bf16.vlgmr.msra.gmra.mxu1 %vm347_vm1, %v1844_v39 }
  0x49   : > { %1770 = vmatprep.mubr.msk.bf16.mxu0 %vm347_vm1, %v1845_v38  ;;  %1778 = vmatprep.mubr.msk.bf16.mxu1 %vm347_vm1, %v1846_v40 }
  0x50   : > { %1771 = vmatmul.mubr.msk.bf16.gmra.mxu0 %vm347_vm1, %v1847_v41  ;;  %1779 = vmatmul.mubr.msk.bf16.gmra.mxu1 %vm347_vm1, %v1848_v42 }
  0xe8   : > { %v1708_v43 = vpop.f32.mrf.mxu0  ;;  %v1738_v44 = vpop.f32.mrf.mxu1 }
  0xe9   : > { %v568_v10 = vadd.f32 %v1738_v44, %v1708_v43 }
  0xea   : > { %v410_v45 = vpop.f32.mrf.mxu0  ;;  %v559_v46 = vpop.f32.mrf.mxu1 }
  0xeb   : > { %v560_v16 = vadd.f32 %v559_v46, %v410_v45 }
  0xec   : > { %v1709_v47 = vpop.f32.mrf.mxu0  ;;  %v1739_v48 = vpop.f32.mrf.mxu1 }
  0xed   : > { %v571_v24 = vadd.f32 %v1739_v48, %v1709_v47 }
  0xee   : > { %v413_v49 = vpop.f32.mrf.mxu0  ;;  %v562_v50 = vpop.f32.mrf.mxu1 }
  0xef   : > { %v563_v33 = vadd.f32 %v562_v50, %v413_v49 }
  0xf0   : > { %v1712_v51 = vpop.f32.mrf.mxu0  ;;  %v1742_v52 = vpop.f32.mrf.mxu1 }
  0xf1   : > { %v584_v41 = vadd.f32 %v1742_v52, %v1712_v51 }
  0xf2   : > { %v2151_v53 = vpop.f32.mrf.mxu0  ;;  %v2153_v54 = vpop.f32.mrf.mxu1 }
  0xf4   : > { %v2155_v55 = vpop.f32.mrf.mxu0  ;;  %v2157_v56 = vpop.f32.mrf.mxu1 }
  0xf6   : > { %v2159_v57 = vpop.f32.mrf.mxu0  ;;  %v2161_v58 = vpop.f32.mrf.mxu1 }
  0xf8   : > { %v1716_v59 = vpop.f32.mrf.mxu0  ;;  %v1746_v60 = vpop.f32.mrf.mxu1 }
  0xf9   : > { %v600_v14 = vadd.f32 %v1746_v60, %v1716_v59  ;;  %v576_v60 = vadd.f32 %v2153_v54, %v2151_v53 }
  0xfa   : > { %v442_v61 = vpop.f32.mrf.mxu0  ;;  %v591_v62 = vpop.f32.mrf.mxu1 }
  0xfb   : > { %v592_v26 = vadd.f32 %v591_v62, %v442_v61 }
  0xfc   : > { %v1717_v63 = vpop.f32.mrf.mxu0  ;;  %v1747_v0 = vpop.f32.mrf.mxu1 }
  0xfd   : > { %v603_v31 = vadd.f32 %v1747_v0, %v1717_v63 }
  0xfe   : > { %v445_v1 = vpop.f32.mrf.mxu0  ;;  %v594_v2 = vpop.f32.mrf.mxu1 }
  0xff   : > { %v595_v39 = vadd.f32 %v594_v2, %v445_v1 }
 0x100   : > { %v1720_v3 = vpop.f32.mrf.mxu0  ;;  %v1750_v4 = vpop.f32.mrf.mxu1 }
 0x101   : > { %v616_v48 = vadd.f32 %v1750_v4, %v1720_v3 }
 0x102   : > { %v2163_v5 = vpop.f32.mrf.mxu0  ;;  %v2165_v6 = vpop.f32.mrf.mxu1 }
 0x103   : > { %v608_v1 = vadd.f32 %v2165_v6, %v2163_v5 }
 0x104   : > { %v2167_v7 = vpop.f32.mrf.mxu0  ;;  %v2169_v8 = vpop.f32.mrf.mxu1 }
 0x106   : > { %v2171_v9 = vpop.f32.mrf.mxu0  ;;  %v2173_v11 = vpop.f32.mrf.mxu1 }
 0x108   : > { %v1768_v12 = vpop.f32.mrf.mxu0  ;;  %v1776_v17 = vpop.f32.mrf.mxu1 }
 0x109   : > { %v860_v15 = vadd.f32 %v1768_v12, %v568_v10  ;;  %v868_v20 = vadd.f32 %v1776_v17, %v600_v14  ;;  %v587_v10 = vadd.f32 %v2157_v56, %v2155_v55 }
 0x10a   : > { %v795_v18 = vpop.f32.mrf.mxu0  ;;  %v827_v22 = vpop.f32.mrf.mxu1 }
 0x10b   : > { %v2181_v19 = vadd.f32 %v2178_v13, %v860_v15  ;;  %v858_v21 = vadd.f32 %v795_v18, %v560_v16  ;;  %v2185_v25 = vadd.f32 %v2178_v13, %v868_v20  ;;  %v866_v29 = vadd.f32 %v827_v22, %v592_v26 }
 0x10c   : > { %v1769_v23 = vpop.f32.mrf.mxu0  ;;  %v1777_v30 = vpop.f32.mrf.mxu1  ;;  %v619_v16 = vadd.f32 %v2169_v8, %v2167_v7 }
 0x10d   : > { %1849 = vtanh.f32 %v2181_v19  ;;  %v861_v27 = vadd.f32 %v1769_v23, %v571_v24  ;;  %v2189_v28 = vadd.f32 %v2178_v13, %v858_v21  ;;  %v869_v35 = vadd.f32 %v1777_v30, %v603_v31  ;;  %v1013_v30 = vld [vmem:[%s2107_s11 + $0x20] sm:$0xff] }
 0x10e   : > { %1851 = vtanh.f32 %v2185_v25  ;;  %v798_v32 = vpop.f32.mrf.mxu0  ;;  %v2196_v36 = vadd.f32 %v2178_v13, %v866_v29  ;;  %v830_v38 = vpop.f32.mrf.mxu1  ;;  %v579_v21 = vadd.f32 %v2161_v58, %v2159_v57  ;;  %v611_v24 = vadd.f32 %v2173_v11, %v2171_v9  ;;  %v1011_v11 = vld [vmem:[%s2107_s11 + $0x10] sm:$0xff] }
 0x10f   : > { %v2192_v34 = vadd.f32 %v2178_v13, %v861_v27  ;;  %1853 = vtanh.f32 %v2189_v28  ;;  %v859_v37 = vadd.f32 %v798_v32, %v563_v33  ;;  %v2200_v42 = vadd.f32 %v2178_v13, %v869_v35  ;;  %v1017_v33 = vld [vmem:[%s2107_s11 + $0x40] sm:$0xff] }
 0x110   : > { %v1772_v40 = vpop.f32.mrf.mxu0  ;;  %v867_v43 = vadd.f32 %v830_v38, %v595_v39  ;;  %v1780_v47 = vpop.f32.mrf.mxu1  ;;  %v1019_v38 = vld [vmem:[%s2107_s11 + $0x50] sm:$0xff]  ;;  %v1014_v39 = vld [vmem:[%s2107_s11 + $0x28] sm:$0xff] }
 0x111   : > { %1855 = vtanh.f32 %v2192_v34  ;;  %v2204_v44 = vadd.f32 %v2178_v13, %v859_v37  ;;  %v864_v45 = vadd.f32 %v1772_v40, %v584_v41  ;;  %v872_v52 = vadd.f32 %v1780_v47, %v616_v48  ;;  %v1012_v37 = vld [vmem:[%s2107_s11 + $0x18] sm:$0xff]  ;;  %v1021_v40 = vld [vmem:[%s2107_s11 + $0x60] sm:$0xff]  ;;  %v1022_v47 = vld [vmem:[%s2107_s11 + $0x68] sm:$0xff] }
 0x112   : > { %1857 = vtanh.f32 %v2196_v36  ;;  %v2208_v49 = vadd.f32 %v2178_v13, %v867_v43  ;;  %v811_v59 = vpop.f32.mrf.mxu0  ;;  %v843_v0 = vpop.f32.mrf.mxu1  ;;  %v1016_v41 = vld [vmem:[%s2107_s11 + $0x38] sm:$0xff]  ;;  %v1023_v43 = vld [vmem:[%s2107_s11 + $0x70] sm:$0xff] }
 0x113   : > { %1859 = vtanh.f32 %v2200_v42  ;;  %v2213_v50 = vadd.f32 %v2178_v13, %v864_v45  ;;  %v2221_v62 = vadd.f32 %v2178_v13, %v872_v52  ;;  %v862_v63 = vadd.f32 %v811_v59, %v576_v60  ;;  %v1018_v45 = vld [vmem:[%s2107_s11 + $0x48] sm:$0xff]  ;;  %v1024_v48 = vld [vmem:[%s2107_s11 + $0x78] sm:$0xff] }
 0x114   : > { %1861 = vtanh.f32 %v2204_v44  ;;  %v870_v54 = vadd.f32 %v843_v0, %v608_v1  ;;  %v1773_v4 = vpop.f32.mrf.mxu0  ;;  %v1781_v6 = vpop.f32.mrf.mxu1  ;;  %v1637_v52 = vmul.f32 -1.442695, %v2185_v25  ;;  %v1627_v59 = vmul.f32 -1.442695, %v2189_v28 }
 0x115   : > { %1863 = vtanh.f32 %v2208_v49  ;;  %v2228_v53 = vadd.f32 %v2178_v13, %v862_v63  ;;  %v865_v14 = vadd.f32 %v1773_v4, %v587_v10  ;;  %v873_v56 = vadd.f32 %v1781_v6, %v619_v16 }
 0x116   : > { %1865 = vtanh.f32 %v2213_v50  ;;  %v2236_v5 = vadd.f32 %v2178_v13, %v870_v54  ;;  %v814_v20 = vpop.f32.mrf.mxu0  ;;  %v846_v22 = vpop.f32.mrf.mxu1  ;;  %v1630_v60 = vmul.f32 -1.442695, %v2192_v34  ;;  %v1638_v63 = vmul.f32 -1.442695, %v2200_v42 }
 0x117   : > { %1867 = vtanh.f32 %v2221_v62  ;;  %v2243_v55 = vadd.f32 %v2178_v13, %v865_v14  ;;  %v2252_v7 = vadd.f32 %v2178_v13, %v873_v56  ;;  %v863_v8 = vadd.f32 %v814_v20, %v579_v21 }
 0x118   : > { %1869 = vtanh.f32 %v2228_v53  ;;  %v871_v58 = vadd.f32 %v846_v22, %v611_v24  ;;  %v1628_v0 = vmul.f32 -1.442695, %v2204_v44  ;;  %v1636_v28 = vmul.f32 -1.442695, %v2208_v49 }
 0x119   : > { %1871 = vtanh.f32 %v2236_v5  ;;  %v2259_v57 = vadd.f32 %v2178_v13, %v863_v8  ;;  %v1631_v44 = vmul.f32 -1.442695, %v2228_v53  ;;  %v1641_v49 = vmul.f32 -1.442695, %v2221_v62  ;;  %v2315_v53 = vpop.permute.xlu0 %1041 }
 0x11a   : > { %v1850_v46 = vpop.eup %1849  ;;  %1873 = vtanh.f32 %v2243_v55  ;;  %v2264_v27 = vadd.f32 %v2178_v13, %v871_v58  ;;  %v1015_v13 = vld [vmem:[%s2107_s11 + $0x30] sm:$0xff]  ;;  %v1634_v16 = vmul.f32 -1.442695, %v2243_v55 }
 0x11b   : > { %1125 = vrot.lane.b32.xlu1 %v1850_v46, %s1986_s22  ;;  %v1852_v51 = vpop.eup %1851  ;;  %1875 = vtanh.f32 %v2252_v7  ;;  %v1020_v46 = vld [vmem:[%s2107_s11 + $0x58] sm:$0xff]  ;;  %v1632_v24 = vmul.f32 -1.442695, %v2259_v57 }
 0x11c   : > { %1141 = vrot.lane.b32.xlu0 %v1852_v51, %s1986_s22  ;;  %v1854_v61 = vpop.eup %1853  ;;  %1877 = vtanh.f32 %v2259_v57  ;;  %v1629_v51 = vmul.f32 -1.442695, %v2181_v19  ;;  %v1633_v19 = vmul.f32 -1.442695, %v2213_v50 }
 0x11d   : > { %1879 = vtanh.f32 %v2264_v27 }
 0x11e   : > { %v1856_v2 = vpop.eup %1855  ;;  %1881 = vpow2.f32 %v1629_v51 }
 0x11f   : > { %v1858_v3 = vpop.eup %1857  ;;  %1127 = vrot.lane.b32.xlu1 %v1856_v2, %s1986_s22  ;;  %1883 = vpow2.f32 %v1637_v52 }
 0x120   : > { %1121 = vrot.lane.b32.xlu0 %v1854_v61, %s1986_s22  ;;  %v1860_v12 = vpop.eup %1859  ;;  %1885 = vpow2.f32 %v1627_v59  ;;  %v1635_v61 = vmul.f32 -1.442695, %v2196_v36 }
 0x121   : > { %v1862_v15 = vpop.eup %1861  ;;  %1887 = vpow2.f32 %v1630_v60 }
 0x122   : > { %v1864_v17 = vpop.eup %1863  ;;  %1889 = vpow2.f32 %v1635_v61 }
 0x123   : > { %1143 = vrot.lane.b32.xlu1 %v1860_v12, %s1986_s22  ;;  %v1866_v18 = vpop.eup %1865  ;;  %1891 = vpow2.f32 %v1638_v63  ;;  %v1639_v12 = vmul.f32 -1.442695, %v2236_v5 }
 0x124   : > { %1137 = vrot.lane.b32.xlu0 %v1858_v3, %s1986_s22  ;;  %v1868_v23 = vpop.eup %1867  ;;  %1893 = vpow2.f32 %v1628_v0 }
 0x125   : > { %v1870_v26 = vpop.eup %1869  ;;  %1895 = vpow2.f32 %v1633_v19 }
 0x126   : > { %v1872_v9 = vpop.eup %1871 }
 0x127   : > { %1139 = vrot.lane.b32.xlu1 %v1864_v17, %s1986_s22  ;;  %v1874_v29 = vpop.eup %1873 }
 0x128   : > { %1123 = vrot.lane.b32.xlu0 %v1862_v15, %s1986_s22  ;;  %v1876_v31 = vpop.eup %1875  ;;  %v2312_v15 = vpop.permute.xlu1 %1043 }
 0x129   : > { %v1878_v32 = vpop.eup %1877 }
 0x12a   : > { %v1880_v35 = vpop.eup %1879 }
 0x12b   : > { %1135 = vrot.lane.b32.xlu1 %v1874_v29, %s1986_s22  ;;  %v1882_v1 = vpop.eup %1881 }
 0x12c   : > { %1133 = vrot.lane.b32.xlu0 %v1866_v18, %s1986_s22  ;;  %v947_v2 = vadd.f32 1.0, %v1882_v1  ;;  %v1884_v25 = vpop.eup %1883 }
 0x12d   : > { %v1886_v34 = vpop.eup %1885  ;;  %v955_v3 = vadd.f32 1.0, %v1884_v25 }
 0x12e   : > { %1897 = vrcp.f32 %v947_v2  ;;  %v1888_v36 = vpop.eup %1887  ;;  %v945_v54 = vadd.f32 1.0, %v1886_v34 }
 0x12f   : > { %1151 = vrot.lane.b32.xlu1 %v1876_v31, %s1986_s22  ;;  %1899 = vpow2.f32 %v1636_v28  ;;  %v1890_v42 = vpop.eup %1889  ;;  %v948_v4 = vadd.f32 1.0, %v1888_v36 }
 0x130   : > { %1149 = vrot.lane.b32.xlu0 %v1868_v23, %s1986_s22  ;;  %1901 = vrcp.f32 %v955_v3  ;;  %v1892_v10 = vpop.eup %1891  ;;  %v953_v50 = vadd.f32 1.0, %v1890_v42 }
 0x131   : > { %1903 = vrcp.f32 %v945_v54  ;;  %v1894_v14 = vpop.eup %1893  ;;  %v956_v6 = vadd.f32 1.0, %v1892_v10 }
 0x132   : > { %1905 = vpow2.f32 %v1631_v44  ;;  %v1896_v17 = vpop.eup %1895  ;;  %v946_v56 = vadd.f32 1.0, %v1894_v14 }
 0x133   : > { %1131 = vrot.lane.b32.xlu1 %v1878_v32, %s1986_s22  ;;  %1907 = vrcp.f32 %v948_v4  ;;  %v951_v21 = vadd.f32 1.0, %v1896_v17 }
 0x134   : > { %1129 = vrot.lane.b32.xlu0 %v1870_v26, %s1986_s22  ;;  %1909 = vrcp.f32 %v953_v50 }
 0x135   : > { %1911 = vpow2.f32 %v1639_v12 }
 0x136   : > { %1913 = vpow2.f32 %v1641_v49 }
 0x137   : > { %1147 = vrot.lane.b32.xlu1 %v1880_v35, %s1986_s22  ;;  %1915 = vrcp.f32 %v956_v6 }
 0x138   : > { %1145 = vrot.lane.b32.xlu0 %v1872_v9, %s1986_s22  ;;  %1917 = vpow2.f32 %v1634_v16 }
 0x139   : > { %1919 = vrcp.f32 %v946_v56 }
 0x13a   : > { %1921 = vrcp.f32 %v951_v21 }
 0x13b   : > { %1047 = vrot.lane.b32.xlu1 %v1012_v37, %s1985_s14  ;;  %v2317_v18 = vpop.eup %1897 }
 0x13c   : > { %1045 = vrot.lane.b32.xlu0 %v1011_v11, %s1985_s14  ;;  %v1900_v62 = vpop.eup %1899 }
 0x13d   : > { %v2321_v55 = vpop.eup %1901  ;;  %v954_v22 = vadd.f32 1.0, %v1900_v62 }
 0x13e   : > { %v2325_v58 = vpop.eup %1903 }
 0x13f   : > { %1051 = vrot.lane.b32.xlu1 %v1014_v39, %s1985_s14  ;;  %v1906_v9 = vpop.eup %1905  ;;  %1923 = vrcp.f32 %v954_v22 }
 0x140   : > { %1049 = vrot.lane.b32.xlu0 %v1013_v30, %s1985_s14  ;;  %v2329_v29 = vpop.eup %1907  ;;  %1925 = vpow2.f32 %v1632_v24  ;;  %v1640_v30 = vmul.f32 -1.442695, %v2264_v27  ;;  %v949_v32 = vadd.f32 1.0, %v1906_v9 }
 0x142   : > { %1927 = vpow2.f32 %v1640_v30 }
 0x143   : > { %1055 = vrot.lane.b32.xlu1 %v1016_v41, %s1985_s14  ;;  %1929 = vrcp.f32 %v949_v32 }
 0x144   : > { %1053 = vrot.lane.b32.xlu0 %v1015_v13, %s1985_s14  ;;  %v2332_v13 = vpop.eup %1909 }
 0x145   : > { %v1912_v35 = vpop.eup %1911 }
 0x146   : > { %v1914_v37 = vpop.eup %1913 }
 0x147   : > { %1059 = vrot.lane.b32.xlu1 %v1018_v45, %s1985_s14  ;;  %v2338_v39 = vpop.eup %1915 }
 0x148   : > { %1057 = vrot.lane.b32.xlu0 %v1017_v33, %s1985_s14  ;;  %v1918_v41 = vpop.eup %1917 }
 0x149   : > { %v952_v51 = vadd.f32 1.0, %v1918_v41 }
 0x14b   : > { %1063 = vrot.lane.b32.xlu1 %v1020_v46, %s1985_s14 }
 0x14c   : > { %1061 = vrot.lane.b32.xlu0 %v1019_v38, %s1985_s14 }
 0x14f   : > { %1067 = vrot.lane.b32.xlu1 %v1022_v47, %s1985_s14  ;;  %v2343_v47 = vpop.eup %1919 }
 0x150   : > { %1065 = vrot.lane.b32.xlu0 %v1021_v40, %s1985_s14  ;;  %v1642_v40 = vmul.f32 -1.442695, %v2252_v7  ;;  %v2347_v52 = vpop.eup %1921  ;;  %v959_v7 = vadd.f32 1.0, %v1914_v37 }
 0x151   : > { %v2351_v63 = vpop.eup %1923 }
 0x152   : > { %1931 = vpow2.f32 %v1642_v40  ;;  %v1926_v0 = vpop.eup %1925 }
 0x153   : > { %1071 = vrot.lane.b32.xlu1 %v1024_v48, %s1985_s14  ;;  %v950_v2 = vadd.f32 1.0, %v1926_v0  ;;  %v1928_v25 = vpop.eup %1927 }
 0x154   : > { %1069 = vrot.lane.b32.xlu0 %v1023_v43, %s1985_s14  ;;  %v957_v43 = vadd.f32 1.0, %v1912_v35  ;;  %v2356_v28 = vpop.eup %1929  ;;  %v958_v36 = vadd.f32 1.0, %v1928_v25 }
 0x156   : > { %1933 = vrcp.f32 %v957_v43 }
 0x157   : > { %1935 = vrcp.f32 %v952_v51  ;;  %v1089_v51 = vmul.f32 %v2325_v58, %v2315_v53 }
 0x158   : > { %1937 = vrcp.f32 %v959_v7 }
 0x159   : > { %1939 = vrcp.f32 %v950_v2 }
 0x15a   : > { %1941 = vrcp.f32 %v958_v36  ;;  %v1090_v36 = vmul.f32 %v2343_v47, %v2312_v15 }
 0x15f   : > { %v1932_v54 = vpop.eup %1931 }
 0x160   : > { %v960_v10 = vadd.f32 1.0, %v1932_v54 }
 0x162   : > { %1943 = vrcp.f32 %v960_v10 }
 0x163   : > { %v2360_v42 = vpop.eup %1933 }
 0x164   : > { %v2363_v50 = vpop.eup %1935 }
 0x165   : > { %v2366_v14 = vpop.eup %1937 }
 0x166   : > { %v2372_v17 = vpop.eup %1939 }
 0x18d   : > { %v1126_v20 = vpop.permute.xlu1 %1125 }
 0x18e   : > { %v1171_v5 = vmul.f32 %v2317_v18, %v1126_v20  ;;  %v1142_v8 = vpop.permute.xlu0 %1141 }
 0x18f   : > { %v1179_v23 = vmul.f32 %v2321_v55, %v1142_v8 }
 0x190   : > { %1205 = vrot.lane.b32.xlu0 %v1171_v5, %s1985_s14  ;;  %v2376_v5 = vpop.eup %1941 }
 0x191   : > { %v1128_v31 = vpop.permute.xlu1 %1127  ;;  %v2380_v8 = vpop.eup %1943 }
 0x192   : > { %v1122_v26 = vpop.permute.xlu0 %1121  ;;  %v1172_v57 = vmul.f32 %v2329_v29, %v1128_v31 }
 0x193   : > { %v1169_v11 = vmul.f32 %v2325_v58, %v1122_v26 }
 0x194   : > { %1221 = vrot.lane.b32.xlu0 %v1179_v23, %s1985_s14  ;;  %1207 = vrot.lane.b32.xlu1 %v1172_v57, %s1985_s14 }
 0x195   : > { %v1144_v27 = vpop.permute.xlu1 %1143 }
 0x196   : > { %v1138_v33 = vpop.permute.xlu0 %1137  ;;  %v1180_v45 = vmul.f32 %v2338_v39, %v1144_v27 }
 0x197   : > { %v1177_v38 = vmul.f32 %v2332_v13, %v1138_v33 }
 0x198   : > { %1201 = vrot.lane.b32.xlu0 %v1169_v11, %s1985_s14  ;;  %1223 = vrot.lane.b32.xlu1 %v1180_v45, %s1985_s14 }
 0x199   : > { %v1140_v60 = vpop.permute.xlu1 %1139 }
 0x19a   : > { %v1124_v46 = vpop.permute.xlu0 %1123  ;;  %v1178_v1 = vmul.f32 %v2351_v63, %v1140_v60 }
 0x19b   : > { %v1170_v48 = vmul.f32 %v2343_v47, %v1124_v46 }
 0x19c   : > { %1217 = vrot.lane.b32.xlu0 %v1177_v38, %s1985_s14 }
 0x19d   : > { %1203 = vrot.lane.b32.xlu1 %v1170_v48, %s1985_s14  ;;  %v1136_v12 = vpop.permute.xlu1 %1135 }
 0x19e   : > { %v1134_v59 = vpop.permute.xlu0 %1133  ;;  %v1176_v49 = vmul.f32 %v2363_v50, %v1136_v12 }
 0x19f   : > { %v1175_v61 = vmul.f32 %v2347_v52, %v1134_v59 }
 0x1a1   : > { %1213 = vrot.lane.b32.xlu0 %v1175_v61, %s1985_s14  ;;  %1219 = vrot.lane.b32.xlu1 %v1178_v1, %s1985_s14  ;;  %v1152_v16 = vpop.permute.xlu1 %1151 }
 0x1a2   : > { %v1150_v19 = vpop.permute.xlu0 %1149  ;;  %v1184_v22 = vmul.f32 %v2380_v8, %v1152_v16 }
 0x1a3   : > { %v1183_v6 = vmul.f32 %v2366_v14, %v1150_v19 }
 0x1a5   : > { %1215 = vrot.lane.b32.xlu1 %v1176_v49, %s1985_s14  ;;  %v1132_v56 = vpop.permute.xlu1 %1131 }
 0x1a6   : > { %v1130_v34 = vpop.permute.xlu0 %1129  ;;  %v1174_v20 = vmul.f32 %v2372_v17, %v1132_v56 }
 0x1a7   : > { %v1173_v3 = vmul.f32 %v2356_v28, %v1130_v34 }
 0x1a9   : > { %1209 = vrot.lane.b32.xlu0 %v1173_v3, %s1985_s14  ;;  %1211 = vrot.lane.b32.xlu1 %v1174_v20, %s1985_s14  ;;  %v1148_v62 = vpop.permute.xlu1 %1147 }
 0x1aa   : > { %v1146_v44 = vpop.permute.xlu0 %1145  ;;  %v1182_v21 = vmul.f32 %v2376_v5, %v1148_v62 }
 0x1ab   : > { %v1181_v4 = vmul.f32 %v2360_v42, %v1146_v44 }
 0x1ad   : > { %1225 = vrot.lane.b32.xlu0 %v1181_v4, %s1985_s14  ;;  %1227 = vrot.lane.b32.xlu1 %v1182_v21, %s1985_s14  ;;  %v1048_v26 = vpop.permute.xlu1 %1047 }
 0x1ae   : > { %v1046_v23 = vpop.permute.xlu0 %1045  ;;  %v1092_v59 = vmul.f32 %v2329_v29, %v1048_v26 }
 0x1af   : > { %v1091_v38 = vmul.f32 %v2317_v18, %v1046_v23 }
 0x1b1   : > { %1229 = vrot.lane.b32.xlu0 %v1183_v6, %s1985_s14  ;;  %1231 = vrot.lane.b32.xlu1 %v1184_v22, %s1985_s14  ;;  %v2384_v11 = vpop.permute.xlu1 %1051 }
 0x1b2   : > { %v1050_v24 = vpop.permute.xlu0 %1049 }
 0x1b3   : > { %v1093_v62 = vmul.f32 %v2356_v28, %v1050_v24 }
 0x1b5   : > { %v2386_v31 = vpop.permute.xlu1 %1055 }
 0x1b6   : > { %v1054_v9 = vpop.permute.xlu0 %1053  ;;  %v1096_v24 = vmul.f32 %v2363_v50, %v2386_v31  ;;  %v1094_v31 = vmul.f32 %v2372_v17, %v2384_v11 }
 0x1b7   : > { %v1095_v54 = vmul.f32 %v2347_v52, %v1054_v9 }
 0x1b9   : > { %v1060_v57 = vpop.permute.xlu1 %1059 }
 0x1ba   : > { %v1058_v30 = vpop.permute.xlu0 %1057  ;;  %v1098_v6 = vmul.f32 %v2351_v63, %v1060_v57 }
 0x1bb   : > { %v1097_v0 = vmul.f32 %v2332_v13, %v1058_v30 }
 0x1bd   : > { %v1064_v35 = vpop.permute.xlu1 %1063 }
 0x1be   : > { %v1062_v32 = vpop.permute.xlu0 %1061  ;;  %v1100_v2 = vmul.f32 %v2338_v39, %v1064_v35 }
 0x1bf   : > { %v1099_v43 = vmul.f32 %v2321_v55, %v1062_v32 }
 0x1c1   : > { %v2389_v40 = vpop.permute.xlu1 %1067 }
 0x1c2   : > { %v1066_v33 = vpop.permute.xlu0 %1065 }
 0x1c3   : > { %v1101_v9 = vmul.f32 %v2360_v42, %v1066_v33 }
 0x1c5   : > { %v2397_v48 = vpop.permute.xlu1 %1071 }
 0x1c6   : > { %v1070_v37 = vpop.permute.xlu0 %1069  ;;  %v1104_v11 = vmul.f32 %v2380_v8, %v2397_v48 }
 0x202   : > { %v1206_v27 = vpop.permute.xlu0 %1205 }
 0x203   : > { %v2391_v41 = vadd.f32 %v1206_v27, %v1091_v38  ;;  %v1103_v38 = vmul.f32 %v2366_v14, %v1070_v37 }
 0x205   : > { %1945 = vtanh.f32 %v2391_v41 }
 0x206   : > { %v1222_v45 = vpop.permute.xlu0 %1221  ;;  %v1208_v61 = vpop.permute.xlu1 %1207 }
 0x207   : > { %v2395_v46 = vadd.f32 %v1222_v45, %v1099_v43  ;;  %v2406_v1 = vadd.f32 %v1208_v61, %v1092_v59  ;;  %v1102_v61 = vmul.f32 %v2376_v5, %v2389_v40 }
 0x209   : > { %1947 = vtanh.f32 %v2395_v46 }
 0x20a   : > { %v1202_v7 = vpop.permute.xlu0 %1201  ;;  %v1224_v25 = vpop.permute.xlu1 %1223 }
 0x20b   : > { %v2403_v60 = vadd.f32 %v1202_v7, %v1089_v51  ;;  %v2413_v34 = vadd.f32 %v1224_v25, %v1100_v2 }
 0x20d   : > { %1949 = vtanh.f32 %v2403_v60 }
 0x20e   : > { %v1218_v19 = vpop.permute.xlu0 %1217  ;;  %1951 = vtanh.f32 %v2406_v1 }
 0x20f   : > { %v2411_v53 = vadd.f32 %v1218_v19, %v1097_v0  ;;  %v1204_v44 = vpop.permute.xlu1 %1203 }
 0x210   : > { %v2421_v4 = vadd.f32 %v1204_v44, %v1090_v36 }
 0x211   : > { %1953 = vtanh.f32 %v2411_v53 }
 0x212   : > { %v1946_v3 = vpop.eup %1945  ;;  %1955 = vtanh.f32 %v2413_v34 }
 0x213   : > { %1301 = vrot.lane.b32.xlu0 %v1946_v3, %s1986_s22  ;;  %v1214_v10 = vpop.permute.xlu0 %1213  ;;  %1957 = vtanh.f32 %v2421_v4  ;;  %v1220_v15 = vpop.permute.xlu1 %1219 }
 0x214   : > { %v2423_v49 = vadd.f32 %v1214_v10, %v1095_v54  ;;  %v2429_v16 = vadd.f32 %v1220_v15, %v1098_v6 }
 0x216   : > { %v1948_v12 = vpop.eup %1947  ;;  %1959 = vtanh.f32 %v2423_v49 }
 0x217   : > { %1317 = vrot.lane.b32.xlu0 %v1948_v12, %s1986_s22  ;;  %1961 = vtanh.f32 %v2429_v16  ;;  %v1216_v27 = vpop.permute.xlu1 %1215 }
 0x218   : > { %v2448_v33 = vadd.f32 %v1216_v27, %v1096_v24 }
 0x21a   : > { %v1950_v56 = vpop.eup %1949 }
 0x21b   : > { %1297 = vrot.lane.b32.xlu0 %v1950_v56, %s1986_s22  ;;  %v1952_v20 = vpop.eup %1951  ;;  %v1210_v22 = vpop.permute.xlu0 %1209 }
 0x21c   : > { %1303 = vrot.lane.b32.xlu1 %v1952_v20, %s1986_s22  ;;  %v2435_v23 = vadd.f32 %v1210_v22, %v1093_v62  ;;  %v1212_v37 = vpop.permute.xlu1 %1211 }
 0x21d   : > { %v2458_v59 = vadd.f32 %v1212_v37, %v1094_v31 }
 0x21e   : > { %v1954_v21 = vpop.eup %1953  ;;  %1963 = vtanh.f32 %v2435_v23 }
 0x21f   : > { %1313 = vrot.lane.b32.xlu0 %v1954_v21, %s1986_s22  ;;  %v1956_v26 = vpop.eup %1955  ;;  %v1226_v30 = vpop.permute.xlu0 %1225 }
 0x220   : > { %1319 = vrot.lane.b32.xlu1 %v1956_v26, %s1986_s22  ;;  %v2441_v32 = vadd.f32 %v1226_v30, %v1101_v9  ;;  %v1958_v57 = vpop.eup %1957  ;;  %v1228_v0 = vpop.permute.xlu1 %1227 }
 0x221   : > { %v2464_v2 = vadd.f32 %v1228_v0, %v1102_v61 }
 0x222   : > { %1965 = vtanh.f32 %v2441_v32 }
 0x223   : > { %v1960_v35 = vpop.eup %1959  ;;  %v1230_v43 = vpop.permute.xlu0 %1229  ;;  %1967 = vtanh.f32 %v2448_v33 }
 0x224   : > { %1299 = vrot.lane.b32.xlu1 %v1958_v57, %s1986_s22  ;;  %1309 = vrot.lane.b32.xlu0 %v1960_v35, %s1986_s22  ;;  %v2451_v45 = vadd.f32 %v1230_v43, %v1103_v38  ;;  %v1962_v51 = vpop.eup %1961  ;;  %v1232_v3 = vpop.permute.xlu1 %1231 }
 0x225   : > { %v2470_v54 = vadd.f32 %v1232_v3, %v1104_v11 }
 0x226   : > { %1969 = vtanh.f32 %v2451_v45 }
 0x227   : > { %1971 = vtanh.f32 %v2458_v59 }
 0x228   : > { %1315 = vrot.lane.b32.xlu1 %v1962_v51, %s1986_s22  ;;  %1973 = vtanh.f32 %v2464_v2 }
 0x229   : > { %1975 = vtanh.f32 %v2470_v54 }
 0x22b   : > { %v1964_v7 = vpop.eup %1963 }
 0x22c   : > { %1305 = vrot.lane.b32.xlu0 %v1964_v7, %s1986_s22 }
 0x22f   : > { %v1966_v19 = vpop.eup %1965 }
 0x230   : > { %1321 = vrot.lane.b32.xlu0 %v1966_v19, %s1986_s22  ;;  %v1968_v25 = vpop.eup %1967 }
 0x231   : > { %1311 = vrot.lane.b32.xlu1 %v1968_v25, %s1986_s22 }
 0x233   : > { %v1970_v36 = vpop.eup %1969 }
 0x234   : > { %1325 = vrot.lane.b32.xlu0 %v1970_v36, %s1986_s22  ;;  %v1972_v40 = vpop.eup %1971 }
 0x235   : > { %1307 = vrot.lane.b32.xlu1 %v1972_v40, %s1986_s22  ;;  %v1974_v44 = vpop.eup %1973 }
 0x236   : > { %v1976_v48 = vpop.eup %1975 }
 0x239   : > { %1323 = vrot.lane.b32.xlu1 %v1974_v44, %s1986_s22 }
 0x23d   : > { %1327 = vrot.lane.b32.xlu1 %v1976_v48, %s1986_s22 }
 0x285   : > { %v1302_v10 = vpop.permute.xlu0 %1301 }
 0x286   : > { %v1347_v12 = vmul.f32 %v2317_v18, %v1302_v10 }
 0x288   : > { %1381 = vrot.lane.b32.xlu0 %v1347_v12, %s1985_s14 }
 0x289   : > { %v1318_v6 = vpop.permute.xlu0 %1317 }
 0x28a   : > { %v1355_v15 = vmul.f32 %v2321_v55, %v1318_v6 }
 0x28c   : > { %1397 = vrot.lane.b32.xlu0 %v1355_v15, %s1985_s14 }
 0x28d   : > { %v1298_v56 = vpop.permute.xlu0 %1297 }
 0x28e   : > { %v1345_v20 = vmul.f32 %v2325_v58, %v1298_v56  ;;  %v1304_v62 = vpop.permute.xlu1 %1303 }
 0x28f   : > { %v1348_v21 = vmul.f32 %v2329_v29, %v1304_v62 }
 0x290   : > { %1377 = vrot.lane.b32.xlu0 %v1345_v20, %s1985_s14 }
 0x291   : > { %v1314_v22 = vpop.permute.xlu0 %1313  ;;  %1383 = vrot.lane.b32.xlu1 %v1348_v21, %s1985_s14 }
 0x292   : > { %v1353_v18 = vmul.f32 %v2332_v13, %v1314_v22  ;;  %v1320_v26 = vpop.permute.xlu1 %1319 }
 0x293   : > { %v1356_v9 = vmul.f32 %v2338_v39, %v1320_v26 }
 0x294   : > { %1393 = vrot.lane.b32.xlu0 %v1353_v18, %s1985_s14 }
 0x295   : > { %1399 = vrot.lane.b32.xlu1 %v1356_v9, %s1985_s14 }
 0x296   : > { %v1300_v55 = vpop.permute.xlu1 %1299  ;;  %v1310_v30 = vpop.permute.xlu0 %1309 }
 0x297   : > { %v1346_v58 = vmul.f32 %v2343_v47, %v1300_v55  ;;  %v1351_v29 = vmul.f32 %v2347_v52, %v1310_v30 }
 0x299   : > { %1379 = vrot.lane.b32.xlu1 %v1346_v58, %s1985_s14  ;;  %1389 = vrot.lane.b32.xlu0 %v1351_v29, %s1985_s14 }
 0x29a   : > { %v1316_v57 = vpop.permute.xlu1 %1315 }
 0x29b   : > { %v1354_v13 = vmul.f32 %v2351_v63, %v1316_v57 }
 0x29d   : > { %1395 = vrot.lane.b32.xlu1 %v1354_v13, %s1985_s14 }
 0x29e   : > { %v1306_v39 = vpop.permute.xlu0 %1305 }
 0x29f   : > { %v1349_v24 = vmul.f32 %v2356_v28, %v1306_v39 }
 0x2a1   : > { %1385 = vrot.lane.b32.xlu0 %v1349_v24, %s1985_s14 }
 0x2a2   : > { %v1322_v35 = vpop.permute.xlu0 %1321 }
 0x2a3   : > { %v1357_v47 = vmul.f32 %v2360_v42, %v1322_v35  ;;  %v1312_v38 = vpop.permute.xlu1 %1311 }
 0x2a4   : > { %v1352_v52 = vmul.f32 %v2363_v50, %v1312_v38 }
 0x2a5   : > { %1401 = vrot.lane.b32.xlu0 %v1357_v47, %s1985_s14 }
 0x2a6   : > { %v1326_v27 = vpop.permute.xlu0 %1325  ;;  %1391 = vrot.lane.b32.xlu1 %v1352_v52, %s1985_s14 }
 0x2a7   : > { %v1359_v43 = vmul.f32 %v2366_v14, %v1326_v27  ;;  %v1308_v63 = vpop.permute.xlu1 %1307 }
 0x2a8   : > { %v1350_v28 = vmul.f32 %v2372_v17, %v1308_v63 }
 0x2a9   : > { %1405 = vrot.lane.b32.xlu0 %v1359_v43, %s1985_s14 }
 0x2aa   : > { %1387 = vrot.lane.b32.xlu1 %v1350_v28, %s1985_s14 }
 0x2ab   : > { %v1324_v51 = vpop.permute.xlu1 %1323 }
 0x2ac   : > { %v1358_v42 = vmul.f32 %v2376_v5, %v1324_v51 }
 0x2ae   : > { %1403 = vrot.lane.b32.xlu1 %v1358_v42, %s1985_s14 }
 0x2af   : > { %v1328_v31 = vpop.permute.xlu1 %1327 }
 0x2b0   : > { %v1360_v50 = vmul.f32 %v2380_v8, %v1328_v31 }
 0x2b2   : > { %1407 = vrot.lane.b32.xlu1 %v1360_v50, %s1985_s14 }
 0x2fa   : > { %v1382_v14 = vpop.permute.xlu0 %1381 }
 0x2fb   : > { %v1428_v17 = vsel %vm1425_vm2, %v1382_v14, %v2391_v41 }
 0x2fc   : > { %1445 = vst.msk [vmem:[%s2515_s25 + $0x10] sm:$0xff] %vm1442_vm3, %v1428_v17 }
 0x2fe   : > { %v1398_v5 = vpop.permute.xlu0 %1397 }
 0x2ff   : > { %v1436_v8 = vsel %vm1425_vm2, %v1398_v5, %v2395_v46 }
 0x300   : > { %1453 = vst.msk [vmem:[%s2515_s25 + $0x50] sm:$0xff] %vm1442_vm3, %v1436_v8 }
 0x302   : > { %v1378_v37 = vpop.permute.xlu0 %1377 }
 0x303   : > { %v1426_v7 = vsel %vm1425_vm2, %v1378_v37, %v2403_v60  ;;  %v1384_v61 = vpop.permute.xlu1 %1383 }
 0x304   : > { %1443 = vst.msk [vmem:[%s2515_s25] sm:$0xff] %vm1442_vm3, %v1426_v7  ;;  %v1429_v41 = vsel %vm1425_vm2, %v1384_v61, %v2406_v1 }
 0x305   : > { %1446 = vst.msk [vmem:[%s2515_s25 + $0x18] sm:$0xff] %vm1442_vm3, %v1429_v41 }
 0x306   : > { %v1394_v0 = vpop.permute.xlu0 %1393 }
 0x307   : > { %v1434_v46 = vsel %vm1425_vm2, %v1394_v0, %v2411_v53  ;;  %v1400_v19 = vpop.permute.xlu1 %1399 }
 0x308   : > { %1451 = vst.msk [vmem:[%s2515_s25 + $0x40] sm:$0xff] %vm1442_vm3, %v1434_v46  ;;  %v1437_v60 = vsel %vm1425_vm2, %v1400_v19, %v2413_v34 }
 0x309   : > { %1454 = vst.msk [vmem:[%s2515_s25 + $0x58] sm:$0xff] %vm1442_vm3, %v1437_v60 }
 0x30b   : > { %v1380_v11 = vpop.permute.xlu1 %1379  ;;  %v1390_v25 = vpop.permute.xlu0 %1389 }
 0x30c   : > { %v1427_v1 = vsel %vm1425_vm2, %v1380_v11, %v2421_v4  ;;  %v1432_v53 = vsel %vm1425_vm2, %v1390_v25, %v2423_v49 }
 0x30d   : > { %1444 = vst.msk [vmem:[%s2515_s25 + $0x8] sm:$0xff] %vm1442_vm3, %v1427_v1  ;;  %1449 = vst.msk [vmem:[%s2515_s25 + $0x30] sm:$0xff] %vm1442_vm3, %v1432_v53 }
 0x30f   : > { %v1396_v3 = vpop.permute.xlu1 %1395 }
 0x310   : > { %v1435_v34 = vsel %vm1425_vm2, %v1396_v3, %v2429_v16 }
 0x311   : > { %1452 = vst.msk [vmem:[%s2515_s25 + $0x48] sm:$0xff] %vm1442_vm3, %v1435_v34 }
 0x313   : > { %v1386_v36 = vpop.permute.xlu0 %1385 }
 0x314   : > { %v1430_v4 = vsel %vm1425_vm2, %v1386_v36, %v2435_v23 }
 0x315   : > { %1447 = vst.msk [vmem:[%s2515_s25 + $0x20] sm:$0xff] %vm1442_vm3, %v1430_v4 }
 0x317   : > { %v1402_v40 = vpop.permute.xlu0 %1401 }
 0x318   : > { %v1438_v49 = vsel %vm1425_vm2, %v1402_v40, %v2441_v32  ;;  %v1392_v44 = vpop.permute.xlu1 %1391 }
 0x319   : > { %1455 = vst.msk [vmem:[%s2515_s25 + $0x60] sm:$0xff] %vm1442_vm3, %v1438_v49  ;;  %v1433_v16 = vsel %vm1425_vm2, %v1392_v44, %v2448_v33 }
 0x31a   : > { %1450 = vst.msk [vmem:[%s2515_s25 + $0x38] sm:$0xff] %vm1442_vm3, %v1433_v16 }
 0x31b   : > { %v1406_v48 = vpop.permute.xlu0 %1405 }
 0x31c   : > { %v1440_v23 = vsel %vm1425_vm2, %v1406_v48, %v2451_v45  ;;  %v1388_v10 = vpop.permute.xlu1 %1387 }
 0x31d   : > { %1457 = vst.msk [vmem:[%s2515_s25 + $0x70] sm:$0xff] %vm1442_vm3, %v1440_v23  ;;  %v1431_v12 = vsel %vm1425_vm2, %v1388_v10, %v2458_v59 }
 0x31e   : > { %1448 = vst.msk [vmem:[%s2515_s25 + $0x28] sm:$0xff] %vm1442_vm3, %v1431_v12 }
 0x320   : > { %v1404_v32 = vpop.permute.xlu1 %1403 }
 0x321   : > { %v1439_v6 = vsel %vm1425_vm2, %v1404_v32, %v2464_v2 }
 0x322   : > { %1456 = vst.msk [vmem:[%s2515_s25 + $0x68] sm:$0xff] %vm1442_vm3, %v1439_v6 }
 0x324   : > { %v1408_v33 = vpop.permute.xlu1 %1407 }
 0x325   : > { %v1441_v15 = vsel %vm1425_vm2, %v1408_v33, %v2470_v54 }
 0x326   : > { %1458 = vst.msk [vmem:[%s2515_s25 + $0x78] sm:$0xff] %vm1442_vm3, %v1441_v15 }
 0x327 PF: > { %s14_s15 = sadd.s32 1, %s1983_s15  }
 0x328   : > { %p11_p4 = scmp.ge.s32.totalorder %s14_s15, 6  }
 0x32a   :  { %13 = sbr.rel (!%p11_p4) target bundleno = 1 (0x1), region = 71 }

</bundles_post_ra>
